<compile_context>
chip_gen: v7x
topology: tpu7x:2x2x1
jax: 0.10.0
libtpu: 0.0.40
codegen_flags: <defaults>
</compile_context>

<pallas_src>
from functools import partial

import jax
import jax.numpy as jnp
from jax import lax
from jax.experimental import pallas as pl
from jax.experimental.pallas import tpu as pltpu


def _gmm_kernel(Bblk, H, W, Cin, L, GC, G, P,
                x_ref, w1_ref, b1_ref, w2_ref, b2_ref, wh_ref, bh_ref,
                out_ref, pad_ref):
    WC = W * Cin
    rows = Bblk * H

    # ---------------- conv1: 3 banded row matmuls + bias + ReLU -------------
    # x_ref is already vertically zero-padded: (Bblk, H+2, W*Cin).
    acc1 = jnp.dot(x_ref[:, 0:H, :].reshape(rows, WC), w1_ref[0],
                   preferred_element_type=jnp.float32)
    for dy in (1, 2):
        acc1 = acc1 + jnp.dot(x_ref[:, dy:dy + H, :].reshape(rows, WC),
                              w1_ref[dy], preferred_element_type=jnp.float32)
    h1 = jnp.maximum(acc1 + b1_ref[...], 0.0)                  # (rows, W*Cin)

    # ---------------- stage h1 into padded scratch for conv2 ----------------
    zrow = jnp.zeros((Bblk, 1, WC), jnp.float32)
    pad_ref[:, 0:1, :] = zrow                  # top zero-pad row
    pad_ref[:, H + 1:H + 2, :] = zrow          # bottom zero-pad row
    pad_ref[:, 1:H + 1, :] = h1.reshape(Bblk, H, WC)

    # ---------------- conv2: 3 banded row matmuls + bias + ReLU -------------
    acc2 = jnp.dot(pad_ref[:, 0:H, :].reshape(rows, WC), w2_ref[0],
                   preferred_element_type=jnp.float32)
    for dy in (1, 2):
        acc2 = acc2 + jnp.dot(pad_ref[:, dy:dy + H, :].reshape(rows, WC),
                              w2_ref[dy], preferred_element_type=jnp.float32)
    h2 = jnp.maximum(acc2 + b2_ref[...], 0.0)                  # (rows, W*L)

    # ---------------- fused average-pool + heads (one MXU matmul) -----------
    # wh_ref already folds the 1/(H*W) pooling scale and the W-fold tiling,
    # so only a lane-dense sublane sum over H remains.
    hr = jnp.dot(h2, wh_ref[...], preferred_element_type=jnp.float32)  # (rows, P)
    head = jnp.sum(hr.reshape(Bblk, H, P), axis=1) + bh_ref[...]       # (Bblk, P)

    # ---------------- heads: mu passthrough, softplus(sigma), softmax(pi) ---
    out_ref[...] = head        # mu lanes + raw sigma/pi lanes + zero pad lanes

    s_pre = head[:, GC:2 * GC]
    # softplus matching torch default (beta=1, threshold=20); log1p keeps
    # accuracy for very negative inputs.
    out_ref[:, GC:2 * GC] = jnp.where(
        s_pre > 20.0, s_pre, jnp.log1p(jnp.exp(jnp.minimum(s_pre, 20.0))))

    logits = head[:, 2 * GC:2 * GC + G]
    z = logits - jnp.max(logits, axis=-1, keepdims=True)
    e = jnp.exp(z)
    out_ref[:, 2 * GC:2 * GC + G] = e / jnp.sum(e, axis=-1, keepdims=True)


def gaussian_mixture_forward(x_nchw, params, *, num_gaussians, num_classes,
                             block_batch=32):
    """Returns (pi, mu, sigma) exactly like the PyTorch module."""
    w1, b1, w2, b2, wmu, bmu, wsig, bsig, wpi, bpi = params
    B, Cin, H, W = x_nchw.shape
    L = w2.shape[-1]
    G, C = num_gaussians, num_classes
    GC = G * C
    nhead = 2 * GC + G
    P = max(128, ((nhead + 127) // 128) * 128)       # lane-dense packed width
    WC, WL = W * Cin, W * L

    # ---- batch chunking (block_batch kept a multiple of 8) -----------------
    if B <= block_batch:
        Bblk, nblk = B, 1
    else:
        Bblk = block_batch
        nblk = (B + Bblk - 1) // Bblk
    Bp = nblk * Bblk

    # ---- lane-dense input slab: (Bp, H+2, W*Cin), vertical zero-pad folded -
    x = jnp.transpose(x_nchw, (0, 2, 3, 1)).astype(jnp.float32)   # NHWC
    x = x.reshape(B, H, WC)                                       # lane = x*Cin+ci
    x = jnp.pad(x, ((0, Bp - B), (1, 1), (0, 0)))

    # ---- banded row weights: fold horizontal taps + x-padding into K -------
    def banded(w_hwio, Cout):
        xin = jnp.arange(W)[:, None]
        xout = jnp.arange(W)[None, :]
        mats = []
        for dy in range(3):
            m = jnp.zeros((W, Cin, W, Cout), jnp.float32)
            for kx in range(3):
                mask = (xin == xout + kx - 1).astype(jnp.float32)     # (W, W)
                m = m + mask[:, None, :, None] * w_hwio[dy, kx][None, :, None, :]
            mats.append(m.reshape(WC, W * Cout))
        return jnp.stack(mats)                         # (3, W*Cin, W*Cout)

    w1b = banded(w1.astype(jnp.float32), Cin)          # (3, WC, WC)
    w2b = banded(w2.astype(jnp.float32), L)            # (3, WC, WL)
    b1r = jnp.tile(b1.astype(jnp.float32), W).reshape(1, WC)
    b2r = jnp.tile(b2.astype(jnp.float32), W).reshape(1, WL)

    # ---- fused, lane-dense heads: [mu | sigma | pi] padded to P lanes ------
    wh = jnp.concatenate([wmu, wsig, wpi], axis=1).astype(jnp.float32)   # (L, nhead)
    wh = jnp.pad(wh, ((0, 0), (0, P - nhead)))
    whb = jnp.tile(wh, (W, 1)) * (1.0 / float(H * W))                    # (W*L, P)
    bh = jnp.concatenate([bmu, bsig, bpi]).astype(jnp.float32)
    bh = jnp.pad(bh, (0, P - nhead)).reshape(1, P)

    grid_spec = pltpu.PrefetchScalarGridSpec(
        num_scalar_prefetch=0,
        grid=(nblk,),
        in_specs=[
            pl.BlockSpec((Bblk, H + 2, WC), lambda b: (b, 0, 0)),
            pl.BlockSpec((3, WC, WC), lambda b: (0, 0, 0)),
            pl.BlockSpec((1, WC), lambda b: (0, 0)),
            pl.BlockSpec((3, WC, WL), lambda b: (0, 0, 0)),
            pl.BlockSpec((1, WL), lambda b: (0, 0)),
            pl.BlockSpec((WL, P), lambda b: (0, 0)),
            pl.BlockSpec((1, P), lambda b: (0, 0)),
        ],
        out_specs=pl.BlockSpec((Bblk, P), lambda b: (b, 0)),
        scratch_shapes=[pltpu.VMEM((Bblk, H + 2, WC), jnp.float32)],
    )

    kernel = partial(_gmm_kernel, Bblk, H, W, Cin, L, GC, G, P)

    packed = pl.pallas_call(
        kernel,
        out_shape=jax.ShapeDtypeStruct((Bp, P), jnp.float32),
        grid_spec=grid_spec,
        compiler_params=pltpu.CompilerParams(
            dimension_semantics=("parallel",),
            vmem_limit_bytes=32 * 1024 * 1024),
    )(x, w1b, b1r, w2b, b2r, whb, bh)

    packed = packed[:B]
    mu = packed[:, 0:GC].reshape(B, G, C)              # .view(-1, G, C)
    sigma = packed[:, GC:2 * GC].reshape(B, G, C)
    pi = packed[:, 2 * GC:2 * GC + G]
    return pi, mu, sigma


def _reference(x_nchw, params, *, num_gaussians, num_classes):
    """Pure-JAX reference mirroring the PyTorch forward (f32, high precision)."""
    w1, b1, w2, b2, wmu, bmu, wsig, bsig, wpi, bpi = params
    B = x_nchw.shape[0]
    hp = lax.Precision.HIGHEST
    x = jnp.transpose(x_nchw, (0, 2, 3, 1)).astype(jnp.float32)  # NHWC
    dn = lax.conv_dimension_numbers(x.shape, w1.shape, ("NHWC", "HWIO", "NHWC"))
    y = lax.conv_general_dilated(x, w1, (1, 1), [(1, 1), (1, 1)],
                                 dimension_numbers=dn, precision=hp) + b1
    y = jnp.maximum(y, 0.0)
    dn2 = lax.conv_dimension_numbers(y.shape, w2.shape, ("NHWC", "HWIO", "NHWC"))
    y = lax.conv_general_dilated(y, w2, (1, 1), [(1, 1), (1, 1)],
                                 dimension_numbers=dn2, precision=hp) + b2
    y = jnp.maximum(y, 0.0)
    feat = y.mean(axis=(1, 2))                                   # (B, L)
    mu = (jnp.dot(feat, wmu, precision=hp) + bmu).reshape(
        B, num_gaussians, num_classes)
    sigma = jax.nn.softplus(jnp.dot(feat, wsig, precision=hp) + bsig).reshape(
        B, num_gaussians, num_classes)
    pi = jax.nn.softmax(jnp.dot(feat, wpi, precision=hp) + bpi, axis=1)
    return pi, mu, sigma


def _init_params(key, in_channels, latent_dim, num_classes, num_gaussians):
    # Deterministic synthetic init (shapes match the PyTorch module).
    ks = jax.random.split(key, 10)
    G, C, L, Cin = num_gaussians, num_classes, latent_dim, in_channels
    w1 = 0.2 * jax.random.normal(ks[0], (3, 3, Cin, Cin), jnp.float32)   # HWIO
    b1 = 0.1 * jax.random.normal(ks[1], (Cin,), jnp.float32)
    w2 = 0.2 * jax.random.normal(ks[2], (3, 3, Cin, L), jnp.float32)     # HWIO
    b2 = 0.1 * jax.random.normal(ks[3], (L,), jnp.float32)
    wmu = 0.2 * jax.random.normal(ks[4], (L, G * C), jnp.float32)        # (in, out)
    bmu = 0.1 * jax.random.normal(ks[5], (G * C,), jnp.float32)
    wsig = 0.2 * jax.random.normal(ks[6], (L, G * C), jnp.float32)
    bsig = 0.1 * jax.random.normal(ks[7], (G * C,), jnp.float32)
    wpi = 0.2 * jax.random.normal(ks[8], (L, G), jnp.float32)
    bpi = 0.1 * jax.random.normal(ks[9], (G,), jnp.float32)
    return (w1, b1, w2, b2, wmu, bmu, wsig, bsig, wpi, bpi)


def _check(x, params, *, num_gaussians, num_classes, block_batch):
    import numpy as np
    pi, mu, sigma = gaussian_mixture_forward(
        x, params, num_gaussians=num_gaussians, num_classes=num_classes,
        block_batch=block_batch)
    jax.block_until_ready((pi, mu, sigma))
    pi_r, mu_r, sig_r = _reference(
        x, params, num_gaussians=num_gaussians, num_classes=num_classes)
    B = x.shape[0]
    assert pi.shape == (B, num_gaussians)
    assert mu.shape == (B, num_gaussians, num_classes)
    assert sigma.shape == (B, num_gaussians, num_classes)
    np.testing.assert_allclose(np.asarray(pi), np.asarray(pi_r),
                               rtol=2e-3, atol=1e-3)
    np.testing.assert_allclose(np.asarray(mu), np.asarray(mu_r),
                               rtol=2e-3, atol=2e-3)
    np.testing.assert_allclose(np.asarray(sigma), np.asarray(sig_r),
                               rtol=2e-3, atol=2e-3)


if __name__ == "__main__":
    # Small shapes consistent with the module:
    in_channels, size = 4, 16
    latent_dim, num_classes, num_gaussians = 32, 10, 4

    key = jax.random.PRNGKey(0)
    kx, kp, kx2 = jax.random.split(key, 3)
    params = _init_params(kp, in_channels, latent_dim, num_classes,
                          num_gaussians)

    # 1) spec-sized demo: batch=2, single grid step
    x = jax.random.normal(kx, (2, in_channels, size, size), jnp.float32)  # NCHW
    _check(x, params, num_gaussians=num_gaussians, num_classes=num_classes,
           block_batch=32)

    # 2) multi-block grid path (batch padding + nblk > 1)
    x2 = jax.random.normal(kx2, (40, in_channels, size, size), jnp.float32)
    _check(x2, params, num_gaussians=num_gaussians, num_classes=num_classes,
           block_batch=16)

    print("KERNEL_OK")
</pallas_src>

<mosaic_0001>
module attributes {stable_mosaic.version = 11 : i64} {
  func.func @_gmm_kernel(%arg0: i32, %arg1: memref<2x18x64xf32, #tpu.memory_space<vmem>>, %arg2: memref<3x64x64xf32, #tpu.memory_space<vmem>>, %arg3: memref<1x64xf32, #tpu.memory_space<vmem>>, %arg4: memref<3x64x512xf32, #tpu.memory_space<vmem>>, %arg5: memref<1x512xf32, #tpu.memory_space<vmem>>, %arg6: memref<512x128xf32, #tpu.memory_space<vmem>>, %arg7: memref<1x128xf32, #tpu.memory_space<vmem>>, %arg8: memref<2x128xf32, #tpu.memory_space<vmem>>, %arg9: memref<2x18x64xf32, #tpu.memory_space<vmem>>) attributes {dimension_semantics = [#tpu.dimension_semantics<parallel>], iteration_bounds = array<i64: 1>, scalar_prefetch = 0 : i64, scratch_operands = 1 : i64, tpu.core_type = #tpu.core_type<tc>, window_params = [{transform_indices = @transform_0, window_bounds = array<i64: 2, 18, 64>}, {pipeline_mode = #tpu.pipeline_mode<synchronous>, transform_indices = @transform_1, window_bounds = array<i64: 3, 64, 64>}, {pipeline_mode = #tpu.pipeline_mode<synchronous>, transform_indices = @transform_2, window_bounds = array<i64: 1, 64>}, {pipeline_mode = #tpu.pipeline_mode<synchronous>, transform_indices = @transform_3, window_bounds = array<i64: 3, 64, 512>}, {pipeline_mode = #tpu.pipeline_mode<synchronous>, transform_indices = @transform_4, window_bounds = array<i64: 1, 512>}, {pipeline_mode = #tpu.pipeline_mode<synchronous>, transform_indices = @transform_5, window_bounds = array<i64: 512, 128>}, {pipeline_mode = #tpu.pipeline_mode<synchronous>, transform_indices = @transform_6, window_bounds = array<i64: 1, 128>}, {transform_indices = @transform_7, window_bounds = array<i64: 2, 128>}]} {
    %c0 = arith.constant 0 : index
    %c0_0 = arith.constant 0 : index
    %c0_1 = arith.constant 0 : index
    %0 = vector.load %arg1[%c0, %c0_0, %c0_1] : memref<2x18x64xf32, #tpu.memory_space<vmem>>, vector<2x16x64xf32>
    %1 = vector.shape_cast %0 : vector<2x16x64xf32> to vector<32x64xf32>
    %c0_2 = arith.constant 0 : index
    %c0_3 = arith.constant 0 : index
    %c0_4 = arith.constant 0 : index
    %2 = vector.load %arg2[%c0_2, %c0_3, %c0_4] : memref<3x64x64xf32, #tpu.memory_space<vmem>>, vector<1x64x64xf32>
    %3 = vector.shape_cast %2 : vector<1x64x64xf32> to vector<64x64xf32>
    %cst = arith.constant dense<0.000000e+00> : vector<32x64xf32>
    %4 = tpu.matmul %1, %3, %cst {dimension_numbers = #tpu.dot_dimension_numbers<[1], [0], [0], [1], [0, 0, 1, 1], [], []>} : vector<32x64xf32>, vector<64x64xf32>, vector<32x64xf32> -> vector<32x64xf32>
    %c0_5 = arith.constant 0 : index
    %c1 = arith.constant 1 : index
    %c0_6 = arith.constant 0 : index
    %5 = vector.load %arg1[%c0_5, %c1, %c0_6] : memref<2x18x64xf32, #tpu.memory_space<vmem>>, vector<2x16x64xf32>
    %6 = vector.shape_cast %5 : vector<2x16x64xf32> to vector<32x64xf32>
    %c1_7 = arith.constant 1 : index
    %c0_8 = arith.constant 0 : index
    %c0_9 = arith.constant 0 : index
    %7 = vector.load %arg2[%c1_7, %c0_8, %c0_9] : memref<3x64x64xf32, #tpu.memory_space<vmem>>, vector<1x64x64xf32>
    %8 = vector.shape_cast %7 : vector<1x64x64xf32> to vector<64x64xf32>
    %cst_10 = arith.constant dense<0.000000e+00> : vector<32x64xf32>
    %9 = tpu.matmul %6, %8, %cst_10 {dimension_numbers = #tpu.dot_dimension_numbers<[1], [0], [0], [1], [0, 0, 1, 1], [], []>} : vector<32x64xf32>, vector<64x64xf32>, vector<32x64xf32> -> vector<32x64xf32>
    %10 = arith.addf %4, %9 : vector<32x64xf32>
    %c0_11 = arith.constant 0 : index
    %c2 = arith.constant 2 : index
    %c0_12 = arith.constant 0 : index
    %11 = vector.load %arg1[%c0_11, %c2, %c0_12] : memref<2x18x64xf32, #tpu.memory_space<vmem>>, vector<2x16x64xf32>
    %12 = vector.shape_cast %11 : vector<2x16x64xf32> to vector<32x64xf32>
    %c2_13 = arith.constant 2 : index
    %c0_14 = arith.constant 0 : index
    %c0_15 = arith.constant 0 : index
    %13 = vector.load %arg2[%c2_13, %c0_14, %c0_15] : memref<3x64x64xf32, #tpu.memory_space<vmem>>, vector<1x64x64xf32>
    %14 = vector.shape_cast %13 : vector<1x64x64xf32> to vector<64x64xf32>
    %cst_16 = arith.constant dense<0.000000e+00> : vector<32x64xf32>
    %15 = tpu.matmul %12, %14, %cst_16 {dimension_numbers = #tpu.dot_dimension_numbers<[1], [0], [0], [1], [0, 0, 1, 1], [], []>} : vector<32x64xf32>, vector<64x64xf32>, vector<32x64xf32> -> vector<32x64xf32>
    %16 = arith.addf %10, %15 : vector<32x64xf32>
    %c0_17 = arith.constant 0 : index
    %c0_18 = arith.constant 0 : index
    %17 = vector.load %arg3[%c0_17, %c0_18] : memref<1x64xf32, #tpu.memory_space<vmem>>, vector<1x64xf32>
    %18 = vector.broadcast %17 : vector<1x64xf32> to vector<32x64xf32>
    %19 = arith.addf %16, %18 : vector<32x64xf32>
    %cst_19 = arith.constant 0.000000e+00 : f32
    %20 = vector.broadcast %cst_19 : f32 to vector<32x64xf32>
    %21 = arith.maximumf %19, %20 : vector<32x64xf32>
    %cst_20 = arith.constant 0.000000e+00 : f32
    %22 = vector.broadcast %cst_20 : f32 to vector<2x1x64xf32>
    %c0_21 = arith.constant 0 : index
    %c0_22 = arith.constant 0 : index
    %c0_23 = arith.constant 0 : index
    %23 = vector.load %arg9[%c0_21, %c0_22, %c0_23] : memref<2x18x64xf32, #tpu.memory_space<vmem>>, vector<2x1x64xf32>
    tpu.vector_store %arg9[%c0_21, %c0_22, %c0_23], %22 {strides = array<i32>} : memref<2x18x64xf32, #tpu.memory_space<vmem>>, vector<2x1x64xf32>,
    %c0_24 = arith.constant 0 : index
    %c17 = arith.constant 17 : index
    %c0_25 = arith.constant 0 : index
    %24 = vector.load %arg9[%c0_24, %c17, %c0_25] : memref<2x18x64xf32, #tpu.memory_space<vmem>>, vector<2x1x64xf32>
    tpu.vector_store %arg9[%c0_24, %c17, %c0_25], %22 {strides = array<i32>} : memref<2x18x64xf32, #tpu.memory_space<vmem>>, vector<2x1x64xf32>,
    %25 = vector.shape_cast %21 : vector<32x64xf32> to vector<2x16x64xf32>
    %c0_26 = arith.constant 0 : index
    %c1_27 = arith.constant 1 : index
    %c0_28 = arith.constant 0 : index
    %26 = vector.load %arg9[%c0_26, %c1_27, %c0_28] : memref<2x18x64xf32, #tpu.memory_space<vmem>>, vector<2x16x64xf32>
    tpu.vector_store %arg9[%c0_26, %c1_27, %c0_28], %25 {strides = array<i32>} : memref<2x18x64xf32, #tpu.memory_space<vmem>>, vector<2x16x64xf32>,
    %c0_29 = arith.constant 0 : index
    %c0_30 = arith.constant 0 : index
    %c0_31 = arith.constant 0 : index
    %27 = vector.load %arg9[%c0_29, %c0_30, %c0_31] : memref<2x18x64xf32, #tpu.memory_space<vmem>>, vector<2x16x64xf32>
    %28 = vector.shape_cast %27 : vector<2x16x64xf32> to vector<32x64xf32>
    %c0_32 = arith.constant 0 : index
    %c0_33 = arith.constant 0 : index
    %c0_34 = arith.constant 0 : index
    %29 = vector.load %arg4[%c0_32, %c0_33, %c0_34] : memref<3x64x512xf32, #tpu.memory_space<vmem>>, vector<1x64x512xf32>
    %30 = vector.shape_cast %29 : vector<1x64x512xf32> to vector<64x512xf32>
    %cst_35 = arith.constant dense<0.000000e+00> : vector<32x512xf32>
    %31 = tpu.matmul %28, %30, %cst_35 {dimension_numbers = #tpu.dot_dimension_numbers<[1], [0], [0], [1], [0, 0, 1, 1], [], []>} : vector<32x64xf32>, vector<64x512xf32>, vector<32x512xf32> -> vector<32x512xf32>
    %c0_36 = arith.constant 0 : index
    %c1_37 = arith.constant 1 : index
    %c0_38 = arith.constant 0 : index
    %32 = vector.load %arg9[%c0_36, %c1_37, %c0_38] : memref<2x18x64xf32, #tpu.memory_space<vmem>>, vector<2x16x64xf32>
    %33 = vector.shape_cast %32 : vector<2x16x64xf32> to vector<32x64xf32>
    %c1_39 = arith.constant 1 : index
    %c0_40 = arith.constant 0 : index
    %c0_41 = arith.constant 0 : index
    %34 = vector.load %arg4[%c1_39, %c0_40, %c0_41] : memref<3x64x512xf32, #tpu.memory_space<vmem>>, vector<1x64x512xf32>
    %35 = vector.shape_cast %34 : vector<1x64x512xf32> to vector<64x512xf32>
    %cst_42 = arith.constant dense<0.000000e+00> : vector<32x512xf32>
    %36 = tpu.matmul %33, %35, %cst_42 {dimension_numbers = #tpu.dot_dimension_numbers<[1], [0], [0], [1], [0, 0, 1, 1], [], []>} : vector<32x64xf32>, vector<64x512xf32>, vector<32x512xf32> -> vector<32x512xf32>
    %37 = arith.addf %31, %36 : vector<32x512xf32>
    %c0_43 = arith.constant 0 : index
    %c2_44 = arith.constant 2 : index
    %c0_45 = arith.constant 0 : index
    %38 = vector.load %arg9[%c0_43, %c2_44, %c0_45] : memref<2x18x64xf32, #tpu.memory_space<vmem>>, vector<2x16x64xf32>
    %39 = vector.shape_cast %38 : vector<2x16x64xf32> to vector<32x64xf32>
    %c2_46 = arith.constant 2 : index
    %c0_47 = arith.constant 0 : index
    %c0_48 = arith.constant 0 : index
    %40 = vector.load %arg4[%c2_46, %c0_47, %c0_48] : memref<3x64x512xf32, #tpu.memory_space<vmem>>, vector<1x64x512xf32>
    %41 = vector.shape_cast %40 : vector<1x64x512xf32> to vector<64x512xf32>
    %cst_49 = arith.constant dense<0.000000e+00> : vector<32x512xf32>
    %42 = tpu.matmul %39, %41, %cst_49 {dimension_numbers = #tpu.dot_dimension_numbers<[1], [0], [0], [1], [0, 0, 1, 1], [], []>} : vector<32x64xf32>, vector<64x512xf32>, vector<32x512xf32> -> vector<32x512xf32>
    %43 = arith.addf %37, %42 : vector<32x512xf32>
    %c0_50 = arith.constant 0 : index
    %c0_51 = arith.constant 0 : index
    %44 = vector.load %arg5[%c0_50, %c0_51] : memref<1x512xf32, #tpu.memory_space<vmem>>, vector<1x512xf32>
    %45 = vector.broadcast %44 : vector<1x512xf32> to vector<32x512xf32>
    %46 = arith.addf %43, %45 : vector<32x512xf32>
    %cst_52 = arith.constant 0.000000e+00 : f32
    %47 = vector.broadcast %cst_52 : f32 to vector<32x512xf32>
    %48 = arith.maximumf %46, %47 : vector<32x512xf32>
    %c0_53 = arith.constant 0 : index
    %c0_54 = arith.constant 0 : index
    %49 = vector.load %arg6[%c0_53, %c0_54] : memref<512x128xf32, #tpu.memory_space<vmem>>, vector<512x128xf32>
    %cst_55 = arith.constant dense<0.000000e+00> : vector<32x128xf32>
    %50 = tpu.matmul %48, %49, %cst_55 {dimension_numbers = #tpu.dot_dimension_numbers<[1], [0], [0], [1], [0, 0, 1, 1], [], []>} : vector<32x512xf32>, vector<512x128xf32>, vector<32x128xf32> -> vector<32x128xf32>
    %51 = vector.shape_cast %50 : vector<32x128xf32> to vector<2x16x128xf32>
    %cst_56 = arith.constant dense<0.000000e+00> : vector<2x128xf32>
    %52 = vector.multi_reduction <add>, %51, %cst_56 [1] : vector<2x16x128xf32> to vector<2x128xf32>
    %c0_57 = arith.constant 0 : index
    %c0_58 = arith.constant 0 : index
    %53 = vector.load %arg7[%c0_57, %c0_58] : memref<1x128xf32, #tpu.memory_space<vmem>>, vector<1x128xf32>
    %54 = vector.broadcast %53 : vector<1x128xf32> to vector<2x128xf32>
    %55 = arith.addf %52, %54 : vector<2x128xf32>
    %c0_59 = arith.constant 0 : index
    %c0_60 = arith.constant 0 : index
    %56 = vector.load %arg8[%c0_59, %c0_60] : memref<2x128xf32, #tpu.memory_space<vmem>>, vector<2x128xf32>
    tpu.vector_store %arg8[%c0_59, %c0_60], %55 {strides = array<i32>} : memref<2x128xf32, #tpu.memory_space<vmem>>, vector<2x128xf32>,
    %57 = vector.extract_strided_slice %55 {offsets = [0, 40], sizes = [2, 40], strides = [1, 1]} : vector<2x128xf32> to vector<2x40xf32>
    %cst_61 = arith.constant 2.000000e+01 : f32
    %58 = vector.broadcast %cst_61 : f32 to vector<2x40xf32>
    %59 = arith.cmpf ogt, %57, %58 : vector<2x40xf32>
    %cst_62 = arith.constant 2.000000e+01 : f32
    %60 = vector.broadcast %cst_62 : f32 to vector<2x40xf32>
    %61 = arith.minimumf %57, %60 : vector<2x40xf32>
    %62 = math.exp %61 : vector<2x40xf32>
    %63 = math.log1p %62 : vector<2x40xf32>
    %64 = arith.select %59, %57, %63 : vector<2x40xi1>, vector<2x40xf32>
    %c0_63 = arith.constant 0 : index
    %c40 = arith.constant 40 : index
    %65 = vector.load %arg8[%c0_63, %c40] : memref<2x128xf32, #tpu.memory_space<vmem>>, vector<2x40xf32>
    tpu.vector_store %arg8[%c0_63, %c40], %64 {strides = array<i32>} : memref<2x128xf32, #tpu.memory_space<vmem>>, vector<2x40xf32>,
    %66 = vector.extract_strided_slice %55 {offsets = [0, 80], sizes = [2, 4], strides = [1, 1]} : vector<2x128xf32> to vector<2x4xf32>
    %cst_64 = arith.constant dense<0xFF800000> : vector<2xf32>
    %67 = vector.multi_reduction <maximumf>, %66, %cst_64 [1] : vector<2x4xf32> to vector<2xf32>
    %68 = vector.shape_cast %67 : vector<2xf32> to vector<2x1xf32>
    %69 = vector.broadcast %68 : vector<2x1xf32> to vector<2x4xf32>
    %70 = arith.subf %66, %69 : vector<2x4xf32>
    %71 = math.exp %70 : vector<2x4xf32>
    %cst_65 = arith.constant dense<0.000000e+00> : vector<2xf32>
    %72 = vector.multi_reduction <add>, %71, %cst_65 [1] : vector<2x4xf32> to vector<2xf32>
    %73 = vector.shape_cast %72 : vector<2xf32> to vector<2x1xf32>
    %74 = vector.broadcast %73 : vector<2x1xf32> to vector<2x4xf32>
    %75 = arith.divf %71, %74 : vector<2x4xf32>
    %c0_66 = arith.constant 0 : index
    %c80 = arith.constant 80 : index
    %76 = vector.load %arg8[%c0_66, %c80] : memref<2x128xf32, #tpu.memory_space<vmem>>, vector<2x4xf32>
    tpu.vector_store %arg8[%c0_66, %c80], %75 {strides = array<i32>} : memref<2x128xf32, #tpu.memory_space<vmem>>, vector<2x4xf32>,
    return
  }
  func.func @transform_0(%arg0: i32) -> (i32, i32, i32) {
    %c0_i32 = arith.constant 0 : i32
    %c0_i32_0 = arith.constant 0 : i32
    %c0_i32_1 = arith.constant 0 : i32
    return %arg0, %c0_i32, %c0_i32_0 : i32, i32, i32
  }
  func.func @transform_1(%arg0: i32) -> (i32, i32, i32) {
    %c0_i32 = arith.constant 0 : i32
    %c0_i32_0 = arith.constant 0 : i32
    %c0_i32_1 = arith.constant 0 : i32
    %c0_i32_2 = arith.constant 0 : i32
    return %c0_i32, %c0_i32_0, %c0_i32_1 : i32, i32, i32
  }
  func.func @transform_2(%arg0: i32) -> (i32, i32) {
    %c0_i32 = arith.constant 0 : i32
    %c0_i32_0 = arith.constant 0 : i32
    %c0_i32_1 = arith.constant 0 : i32
    return %c0_i32, %c0_i32_0 : i32, i32
  }
  func.func @transform_3(%arg0: i32) -> (i32, i32, i32) {
    %c0_i32 = arith.constant 0 : i32
    %c0_i32_0 = arith.constant 0 : i32
    %c0_i32_1 = arith.constant 0 : i32
    %c0_i32_2 = arith.constant 0 : i32
    return %c0_i32, %c0_i32_0, %c0_i32_1 : i32, i32, i32
  }
  func.func @transform_4(%arg0: i32) -> (i32, i32) {
    %c0_i32 = arith.constant 0 : i32
    %c0_i32_0 = arith.constant 0 : i32
    %c0_i32_1 = arith.constant 0 : i32
    return %c0_i32, %c0_i32_0 : i32, i32
  }
  func.func @transform_5(%arg0: i32) -> (i32, i32) {
    %c0_i32 = arith.constant 0 : i32
    %c0_i32_0 = arith.constant 0 : i32
    %c0_i32_1 = arith.constant 0 : i32
    return %c0_i32, %c0_i32_0 : i32, i32
  }
  func.func @transform_6(%arg0: i32) -> (i32, i32) {
    %c0_i32 = arith.constant 0 : i32
    %c0_i32_0 = arith.constant 0 : i32
    %c0_i32_1 = arith.constant 0 : i32
    return %c0_i32, %c0_i32_0 : i32, i32
  }
  func.func @transform_7(%arg0: i32) -> (i32, i32) {
    %c0_i32 = arith.constant 0 : i32
    %c0_i32_0 = arith.constant 0 : i32
    return %arg0, %c0_i32 : i32, i32
  }
}

</mosaic_0001>

<bundles_post_ra>
// kernel: tpu_custom_call.1
= control target key start
LH: loop header
LB: loop body
LE: loop exit
PB: predicated region body
PF: predicated region fallthrough
CT: control target
= control target key end

     0   :  { %12 = vsyncpa [#allocation4], 0  ;;  %s2361_s0 = inlined_call_operand.vmem [shape: f32[2,18,64], index: 0, kind: input, shape index: {}]   ;;  %s2362_s1 = inlined_call_operand.hbm [shape: f32[3,64,64], index: 1, kind: input, shape index: {}]   ;;  %s2363_s2 = inlined_call_operand.vmem [shape: f32[1,64], index: 2, kind: input, shape index: {}]   ;;  %s2364_s3 = inlined_call_operand.hbm [shape: f32[3,64,512], index: 3, kind: input, shape index: {}]   ;;  %s2365_s4 = inlined_call_operand.vmem [shape: f32[1,512], index: 4, kind: input, shape index: {}]   ;;  %s2366_s5 = inlined_call_operand.hbm [shape: f32[512,128], index: 5, kind: input, shape index: {}]   ;;  %s2367_s6 = inlined_call_operand.vmem [shape: f32[1,128], index: 6, kind: input, shape index: {}]   ;;  %s2368_s7 = inlined_call_operand.hbm [shape: f32[2,128], index: 7, kind: output, shape index: {}]  }
   0x1   :  { %13 = vsyncpa [#allocation7], 0 }
   0x2   :  { %14 = vsyncpa [#allocation5], 0  ;;  %s2126_s24 = smov [#allocation6]   ;;  %s2032_s28 = scalar_lea.hbm %s2364_s3, 12288 }
   0x3   :  { %s36_s25 = sshll.u32 %s2126_s24, 4  ;;  %p2033_p0 = scmp.ne.s32.totalorder %s2364_s3, %s2032_s28  ;;  %s37_s25 = int_to_ptr.vmem [resolvable:$true] %s36_s25 }
   0x4   :  { %p2036_p1 = scmp.lt.u32.totalorder %s2032_s28, %s2364_s3 }
   0x6   :  { %p2038_p2 = pnand %p2036_p1, %p2033_p0 }
   0x8   :  { %2041 = shalt.err (!%p2038_p2)
}
   0x9   :  { %s2042_s10 = scalar_lea.vmem %s37_s25, 12288  ;;  %p2047_p4 = scmp.lt.s32.totalorder %s37_s25, %s37_s25 }
   0xa   :  { %p2043_p3 = scmp.ne.s32.totalorder %s37_s25, %s2042_s10  ;;  %p2048_p5 = scmp.lt.s32.totalorder %s2042_s10, %s2042_s10 }
   0xc   :  { %p2049_p6 = por %p2048_p5, %p2047_p4 }
   0xe   :  { %p2050_p7 = pnand %p2049_p6, %p2043_p3 }
  0x10   :  { %2053 = shalt.err (!%p2050_p7)
}
  0x11   :  { %s2127_s11 = smov 512   ;;  %s2128_s12 = smov 32  }
  0x12   :  { %42 = dma.hbm_to_vmem [thread:$0]  %s2364_s3, 12288, %s37_s25, [#allocation7], %s2127_s11, %s2127_s11, %s2128_s12  }
  0x13   :  { %s2129_s15 = smov [#allocation3]   ;;  %s2054_s19 = scalar_lea.hbm %s2362_s1, 3072 }
  0x14   :  { %s22_s16 = sshll.u32 %s2129_s15, 4  ;;  %p2055_p8 = scmp.ne.s32.totalorder %s2362_s1, %s2054_s19  ;;  %s23_s16 = int_to_ptr.vmem [resolvable:$true] %s22_s16 }
  0x15   :  { %p2058_p9 = scmp.lt.u32.totalorder %s2054_s19, %s2362_s1 }
  0x17   :  { %p2060_p10 = pnand %p2058_p9, %p2055_p8 }
  0x19   :  { %2063 = shalt.err (!%p2060_p10)
}
  0x1a   :  { %s2064_s24 = scalar_lea.vmem %s23_s16, 3072  ;;  %p2069_p12 = scmp.lt.s32.totalorder %s23_s16, %s23_s16 }
  0x1b   :  { %p2065_p11 = scmp.ne.s32.totalorder %s23_s16, %s2064_s24  ;;  %p2070_p13 = scmp.lt.s32.totalorder %s2064_s24, %s2064_s24 }
  0x1d   :  { %p2071_p0 = por %p2070_p13, %p2069_p12 }
  0x1f   :  { %p2072_p1 = pnand %p2071_p0, %p2065_p11 }
  0x21   :  { %2075 = shalt.err (!%p2072_p1)
}
  0x22   :  { %s2130_s3 = smov 128   ;;  %s2131_s25 = smov 8  }
  0x23   :  { %28 = dma.hbm_to_vmem [thread:$0]  %s2362_s1, 3072, %s23_s16, [#allocation4], %s2130_s3, %s2130_s3, %s2131_s25  }
  0x24   :  { %s2132_s28 = smov [#allocation8]   ;;  %s2076_s9 = scalar_lea.hbm %s2366_s5, 8192 }
  0x25   :  { %s50_s29 = sshll.u32 %s2132_s28, 4  ;;  %p2077_p2 = scmp.ne.s32.totalorder %s2366_s5, %s2076_s9  ;;  %s51_s29 = int_to_ptr.vmem [resolvable:$true] %s50_s29 }
  0x26   :  { %p2080_p3 = scmp.lt.u32.totalorder %s2076_s9, %s2366_s5 }
  0x28   :  { %p2082_p4 = pnand %p2080_p3, %p2077_p2 }
  0x2a   :  { %2085 = shalt.err (!%p2082_p4)
}
  0x2b   :  { %s2086_s14 = scalar_lea.vmem %s51_s29, 8192  ;;  %p2091_p6 = scmp.lt.s32.totalorder %s51_s29, %s51_s29 }
  0x2c   :  { %p2087_p5 = scmp.ne.s32.totalorder %s51_s29, %s2086_s14  ;;  %p2092_p7 = scmp.lt.s32.totalorder %s2086_s14, %s2086_s14 }
  0x2e   :  { %p2093_p8 = por %p2092_p7, %p2091_p6 }
  0x30   :  { %p2094_p9 = pnand %p2093_p8, %p2087_p5 }
  0x32   :  { %2097 = shalt.err (!%p2094_p9)
}
  0x33   :  { %56 = dma.hbm_to_vmem [thread:$0]  %s2366_s5, 8192, %s51_s29, [#allocation7], %s2130_s3, %s2130_s3, %s2131_s25  }
  0x34   :  { %2120 = dma.done.wait [#allocation4], 3072  }
  0x35   :  { %2121 = vsyncadd [#allocation4], 4294964224 }
  0x36   :  { %2122 = dma.done.wait [#allocation7], 20480  }
  0x37   :  { %2123 = vsyncadd [#allocation7], 4294946816  ;;  %v85_v0 = vld [vmem:[#allocation3 + $0x40] sm:$0xff]  ;;  %v86_v1 = vld [vmem:[#allocation3 + $0x48] sm:$0xff]  ;;  %vm93_vm0 = vcmask 523264   ;;  %vm417_vm1 = vcmask 516096  }
  0x38   :  { %v87_v2 = vld [vmem:[#allocation3 + $0x50] sm:$0xff]  ;;  %v1758_v3 = vpack.c.bf16 %v86_v1, %v85_v0  ;;  %v88_v4 = vld [vmem:[#allocation3 + $0x58] sm:$0xff]  ;;  %v89_v6 = vld [vmem:[#allocation3 + $0x60] sm:$0xff]  ;;  %vm1436_vm2 = vcmask 1041409   ;;  %vm1475_vm3 = vcmask 681600   ;;  %vm1473_vm8 = vcmask 648512  }
  0x39   :  { %v1762_v5 = vpack.c.bf16 %v88_v4, %v87_v2  ;;  %v90_v7 = vld [vmem:[#allocation3 + $0x68] sm:$0xff]  ;;  %v80_v8 = vld [vmem:[%s2361_s0 + $0x1] sm:$0xff]  ;;  %v72_v13 = vld [vmem:[#allocation3] sm:$0xff]  ;;  %v2133_v2 = vmov 0.0   ;;  %vm1496_vm9 = vcmask 25600   ;;  %s2135_s17 = smov [#allocation9]  }
  0x3a   :  { %1759 = vmatprep.subr.bf16.mxu0 %v1758_v3  ;;  %1708 = vmatprep.mubr.msk.f32.mxu0 %vm93_vm0, %v80_v8  ;;  %v1766_v9 = vpack.c.bf16 %v90_v7, %v89_v6  ;;  %v91_v10 = vld [vmem:[#allocation3 + $0x70] sm:$0xff]  ;;  %v92_v11 = vld [vmem:[#allocation3 + $0x78] sm:$0xff]  ;;  %v73_v14 = vld [vmem:[#allocation3 + $0x8] sm:$0xff]  ;;  %418 = vst.msk [vmem:[#allocation2] sm:$0x1] %vm417_vm1, %v2133_v2  ;;  %s1520_s5 = sshll.u32 %s2135_s17, 4  ;;  %s1521_s5 = int_to_ptr.vmem [resolvable:$true] %s1520_s5 }
  0x3b   :  { %1761 = vmatpush3.bf16.msra.mxu0 %v1758_v3  ;;  %v1770_v12 = vpack.c.bf16 %v92_v11, %v91_v10  ;;  %v468_v15 = vld [vmem:[#allocation6 + $0x108] sm:$0xff]  ;;  %v467_v17 = vld [vmem:[#allocation6 + $0x100] sm:$0xff]  ;;  %v1774_v18 = vpack.c.bf16 %v73_v14, %v72_v13  ;;  %v74_v21 = vld [vmem:[#allocation3 + $0x10] sm:$0xff]  ;;  %575 = vmatprep.mubr.f32.mxu1 %v2133_v2  ;;  %419 = vst.msk [vmem:[#allocation2 + $0x18] sm:$0x1] %vm417_vm1, %v2133_v2  ;;  %s2098_s18 = scalar_lea.vmem %s1521_s5, 32  ;;  %p2103_p11 = scmp.lt.s32.totalorder %s1521_s5, %s1521_s5 }
  0x3c   :  { %1763 = vmatprep.subr.bf16.mxu0 %v1762_v5  ;;  %v472_v16 = vld [vmem:[#allocation6 + $0x128] sm:$0xff]  ;;  %v471_v20 = vld [vmem:[#allocation6 + $0x120] sm:$0xff]  ;;  %v75_v22 = vld [vmem:[#allocation3 + $0x18] sm:$0xff]  ;;  %420 = vst.msk [vmem:[#allocation2 + $0x11] sm:$0x1] %vm417_vm1, %v2133_v2  ;;  %p2099_p10 = scmp.ne.s32.totalorder %s1521_s5, %s2098_s18  ;;  %p2104_p12 = scmp.lt.s32.totalorder %s2098_s18, %s2098_s18 }
  0x3d   :  { %v1806_v19 = vpack.c.bf16 %v472_v16, %v468_v15  ;;  %v1808_v23 = vpack.c.bf16 %v471_v20, %v467_v17  ;;  %v81_v24 = vld [vmem:[%s2361_s0 + $0x9] sm:$0xff]  ;;  %v1778_v25 = vpack.c.bf16 %v75_v22, %v74_v21  ;;  %v82_v26 = vld [vmem:[%s2361_s0 + $0x19] sm:$0xff]  ;;  %v83_v29 = vld [vmem:[%s2361_s0 + $0x21] sm:$0xff]  ;;  %421 = vst.msk [vmem:[#allocation2 + $0x29] sm:$0x1] %vm417_vm1, %v2133_v2 }
  0x3e   :  { %v76_v27 = vld [vmem:[#allocation3 + $0x20] sm:$0xff]  ;;  %v77_v28 = vld [vmem:[#allocation3 + $0x28] sm:$0xff]  ;;  %v68_v31 = vld [vmem:[%s2361_s0] sm:$0xff]  ;;  %p2105_p13 = por %p2104_p12, %p2103_p11 }
  0x3f   :  { %1765 = vmatpush3.bf16.msra.mxu0 %v1762_v5  ;;  %1807 = vmatprep.subr.bf16.mxu1 %v1806_v19  ;;  %v1782_v30 = vpack.c.bf16 %v77_v28, %v76_v27  ;;  %v78_v32 = vld [vmem:[#allocation3 + $0x30] sm:$0xff]  ;;  %v79_v33 = vld [vmem:[#allocation3 + $0x38] sm:$0xff]  ;;  %v293_v35 = vld [vmem:[#allocation3 + $0x80] sm:$0xff] }
  0x40   :  { %1767 = vmatprep.subr.bf16.mxu0 %v1766_v9  ;;  %1809 = vmatpush1.bf16.msra.mxu1 %v1808_v23  ;;  %v1786_v34 = vpack.c.bf16 %v79_v33, %v78_v32  ;;  %v294_v36 = vld [vmem:[#allocation3 + $0x88] sm:$0xff]  ;;  %v295_v38 = vld [vmem:[#allocation3 + $0x90] sm:$0xff]  ;;  %v296_v39 = vld [vmem:[#allocation3 + $0x98] sm:$0xff]  ;;  %p2106_p0 = pnand %p2105_p13, %p2099_p10 }
  0x41   :  { %v1790_v37 = vpack.c.bf16 %v294_v36, %v293_v35  ;;  %v69_v40 = vld [vmem:[%s2361_s0 + $0x8] sm:$0xff]  ;;  %v1794_v41 = vpack.c.bf16 %v296_v39, %v295_v38  ;;  %v70_v42 = vld [vmem:[%s2361_s0 + $0x18] sm:$0xff]  ;;  %v297_v43 = vld [vmem:[#allocation3 + $0xa0] sm:$0xff] }
  0x42   :  { %v298_v44 = vld [vmem:[#allocation3 + $0xa8] sm:$0xff]  ;;  %v71_v45 = vld [vmem:[%s2361_s0 + $0x20] sm:$0xff]  ;;  %v300_v49 = vld [vmem:[#allocation3 + $0xb8] sm:$0xff] }
  0x43   :  { %1769 = vmatpush3.bf16.msra.mxu0 %v1766_v9  ;;  %v1798_v46 = vpack.c.bf16 %v298_v44, %v297_v43  ;;  %v288_v47 = vld [vmem:[%s2361_s0 + $0x2] sm:$0xff]  ;;  %v289_v51 = vld [vmem:[%s2361_s0 + $0xa] sm:$0xff]  ;;  %v290_v52 = vld [vmem:[%s2361_s0 + $0x1a] sm:$0xff] }
  0x44   :  { %1771 = vmatprep.subr.bf16.mxu0 %v1770_v12  ;;  %v299_v48 = vld [vmem:[#allocation3 + $0xb0] sm:$0xff]  ;;  %v476_v54 = vld [vmem:[#allocation6 + $0x148] sm:$0xff]  ;;  %v475_v57 = vld [vmem:[#allocation6 + $0x140] sm:$0xff] }
  0x45   :  { %v1802_v50 = vpack.c.bf16 %v300_v49, %v299_v48  ;;  %v291_v53 = vld [vmem:[%s2361_s0 + $0x22] sm:$0xff]  ;;  %v480_v55 = vld [vmem:[#allocation6 + $0x168] sm:$0xff]  ;;  %v479_v58 = vld [vmem:[#allocation6 + $0x160] sm:$0xff] }
  0x46   :  { %v1810_v56 = vpack.c.bf16 %v480_v55, %v476_v54  ;;  %v1812_v59 = vpack.c.bf16 %v479_v58, %v475_v57  ;;  %v484_v60 = vld [vmem:[#allocation6 + $0x188] sm:$0xff]  ;;  %v483_v63 = vld [vmem:[#allocation6 + $0x180] sm:$0xff]  ;;  %v470_v9 = vld [vmem:[#allocation6 + $0x118] sm:$0xff] }
  0x47   :  { %1773 = vmatpush3.bf16.msra.mxu0 %v1770_v12  ;;  %v488_v61 = vld [vmem:[#allocation6 + $0x1a8] sm:$0xff]  ;;  %v487_v0 = vld [vmem:[#allocation6 + $0x1a0] sm:$0xff]  ;;  %v474_v10 = vld [vmem:[#allocation6 + $0x138] sm:$0xff] }
  0x48   :  { %1775 = vmatprep.subr.bf16.mxu0 %v1774_v18  ;;  %1811 = vmatprep.subr.bf16.mxu1 %v1810_v56  ;;  %v1814_v62 = vpack.c.bf16 %v488_v61, %v484_v60  ;;  %v1816_v1 = vpack.c.bf16 %v487_v0, %v483_v63  ;;  %v492_v3 = vld [vmem:[#allocation6 + $0x1c8] sm:$0xff]  ;;  %v491_v6 = vld [vmem:[#allocation6 + $0x1c0] sm:$0xff]  ;;  %v1822_v11 = vpack.c.bf16 %v474_v10, %v470_v9  ;;  %v1194_v17 = vld [vmem:[#allocation8 + $0x90] sm:$0xff] }
  0x49   :  { %1813 = vmatpush1.bf16.msra.mxu1 %v1812_v59  ;;  %v496_v4 = vld [vmem:[#allocation6 + $0x1e8] sm:$0xff]  ;;  %v495_v7 = vld [vmem:[#allocation6 + $0x1e0] sm:$0xff]  ;;  %v1178_v21 = vld [vmem:[#allocation8 + $0x10] sm:$0xff] }
  0x4a   :  { %1709 = vmatmul.mubr.msk.f32.vlgmr.msra.gmra.mrb[0].mxu0 %vm93_vm0, %v81_v24  ;;  %1815 = vmatprep.subr.bf16.mxu1 %v1814_v62  ;;  %v1818_v5 = vpack.c.bf16 %v496_v4, %v492_v3  ;;  %v1820_v8 = vpack.c.bf16 %v495_v7, %v491_v6  ;;  %v1192_v12 = vld [vmem:[#allocation8 + $0x80] sm:$0xff]  ;;  %v1193_v13 = vld [vmem:[#allocation8 + $0x88] sm:$0xff]  ;;  %v1179_v22 = vld [vmem:[#allocation8 + $0x18] sm:$0xff] }
  0x4b   :  { %1777 = vmatpush3.bf16.msra.mxu0 %v1774_v18  ;;  %1711 = vmatprep.mubr.msk.f32.mxu0 %vm93_vm0, %v82_v26  ;;  %v1176_v14 = vld [vmem:[#allocation8] sm:$0xff]  ;;  %v1902_v15 = vpack.c.bf16 %v1193_v13, %v1192_v12  ;;  %v1177_v16 = vld [vmem:[#allocation8 + $0x8] sm:$0xff]  ;;  %v1195_v18 = vld [vmem:[#allocation8 + $0x98] sm:$0xff] }
  0x4c   :  { %1779 = vmatprep.subr.bf16.mxu0 %v1778_v25  ;;  %v1904_v19 = vpack.c.bf16 %v1177_v16, %v1176_v14  ;;  %v1906_v20 = vpack.c.bf16 %v1195_v18, %v1194_v17  ;;  %v1196_v23 = vld [vmem:[#allocation8 + $0xa0] sm:$0xff]  ;;  %v1197_v24 = vld [vmem:[#allocation8 + $0xa8] sm:$0xff]  ;;  %v1182_v33 = vld [vmem:[#allocation8 + $0x30] sm:$0xff] }
  0x4d   :  { %1817 = vmatpush1.bf16.msra.mxu1 %v1816_v1  ;;  %v1910_v26 = vpack.c.bf16 %v1197_v24, %v1196_v23  ;;  %v1180_v27 = vld [vmem:[#allocation8 + $0x20] sm:$0xff]  ;;  %v1181_v28 = vld [vmem:[#allocation8 + $0x28] sm:$0xff]  ;;  %v1542_v49 = vld [vmem:[%s2363_s2] ss:$0 sm:$0xff] }
  0x4e   :  { %1712 = vmatmul.mubr.msk.f32.gmra.mrb[2].mxu0 %vm93_vm0, %v83_v29  ;;  %1819 = vmatprep.subr.bf16.mxu1 %v1818_v5  ;;  %v1198_v29 = vld [vmem:[#allocation8 + $0xb0] sm:$0xff]  ;;  %v1200_v35 = vld [vmem:[#allocation8 + $0xc0] sm:$0xff]  ;;  %v1201_v36 = vld [vmem:[#allocation8 + $0xc8] sm:$0xff] }
  0x4f   :  { %1781 = vmatpush3.bf16.msra.mxu0 %v1778_v25  ;;  %1730 = vmatprep.mubr.msk.f32.mxu0 %vm93_vm0, %v68_v31  ;;  %v1908_v25 = vpack.c.bf16 %v1179_v22, %v1178_v21  ;;  %v1912_v31 = vpack.c.bf16 %v1181_v28, %v1180_v27  ;;  %v1918_v38 = vpack.c.bf16 %v1201_v36, %v1200_v35  ;;  %v1184_v39 = vld [vmem:[#allocation8 + $0x40] sm:$0xff]  ;;  %v1205_v48 = vld [vmem:[#allocation8 + $0xe8] sm:$0xff]  ;;  %v469_v4 = vld [vmem:[#allocation6 + $0x110] sm:$0xff] }
  0x50   :  { %1783 = vmatprep.subr.bf16.mxu0 %v1782_v30  ;;  %v473_v5 = vld [vmem:[#allocation6 + $0x130] sm:$0xff]  ;;  %v478_v6 = vld [vmem:[#allocation6 + $0x158] sm:$0xff]  ;;  %v431_v27 = vld [vmem:[#allocation6 + $0x8] sm:$0xff] }
  0x51   :  { %1821 = vmatpush1.bf16.msra.mxu1 %v1820_v8  ;;  %v482_v7 = vld [vmem:[#allocation6 + $0x178] sm:$0xff]  ;;  %v1824_v8 = vpack.c.bf16 %v473_v5, %v469_v4  ;;  %v477_v10 = vld [vmem:[#allocation6 + $0x150] sm:$0xff]  ;;  %v435_v28 = vld [vmem:[#allocation6 + $0x28] sm:$0xff] }
  0x52   :  { %1823 = vmatprep.subr.bf16.mxu1 %v1822_v11  ;;  %v1826_v9 = vpack.c.bf16 %v482_v7, %v478_v6  ;;  %v481_v11 = vld [vmem:[#allocation6 + $0x170] sm:$0xff]  ;;  %v486_v13 = vld [vmem:[#allocation6 + $0x198] sm:$0xff]  ;;  %v443_v35 = vld [vmem:[#allocation6 + $0x68] sm:$0xff] }
  0x53   :  { %1785 = vmatpush3.bf16.msra.mxu0 %v1782_v30  ;;  %v1199_v30 = vld [vmem:[#allocation8 + $0xb8] sm:$0xff]  ;;  %v485_v17 = vld [vmem:[#allocation6 + $0x190] sm:$0xff] }
  0x54   :  { %1787 = vmatprep.subr.bf16.mxu0 %v1786_v34  ;;  %v1914_v32 = vpack.c.bf16 %v1199_v30, %v1198_v29  ;;  %v490_v14 = vld [vmem:[#allocation6 + $0x1b8] sm:$0xff]  ;;  %v489_v18 = vld [vmem:[#allocation6 + $0x1b0] sm:$0xff]  ;;  %v1838_v30 = vpack.c.bf16 %v435_v28, %v431_v27  ;;  %v892_v27 = vld [vmem:[#allocation6 + $0x240] sm:$0xff] }
  0x55   :  { %v1830_v16 = vpack.c.bf16 %v490_v14, %v486_v13  ;;  %v498_v21 = vld [vmem:[#allocation6 + $0x1f8] sm:$0xff]  ;;  %v1832_v22 = vpack.c.bf16 %v489_v18, %v485_v17  ;;  %v493_v24 = vld [vmem:[#allocation6 + $0x1d0] sm:$0xff]  ;;  %v889_v17 = vld [vmem:[#allocation6 + $0x228] sm:$0xff] }
  0x56   :  { %v448_v6 = vld [vmem:[#allocation6 + $0x90] sm:$0xff]  ;;  %v896_v28 = vld [vmem:[#allocation6 + $0x260] sm:$0xff] }
  0x57   :  { %1789 = vmatpush3.bf16.msra.mxu0 %v1786_v34  ;;  %v1183_v34 = vld [vmem:[#allocation8 + $0x38] sm:$0xff]  ;;  %v452_v7 = vld [vmem:[#allocation6 + $0xb0] sm:$0xff] }
  0x58   :  { %1791 = vmatprep.subr.bf16.mxu0 %v1790_v37  ;;  %v456_v13 = vld [vmem:[#allocation6 + $0xd0] sm:$0xff] }
  0x59   :  { %v460_v14 = vld [vmem:[#allocation6 + $0xf0] sm:$0xff] }
  0x5a   :  { %1731 = vmatmul.mubr.msk.f32.vlgmr.msra.gmra.mrb[0].mxu0 %vm93_vm0, %v69_v40  ;;  %v1185_v40 = vld [vmem:[#allocation8 + $0x48] sm:$0xff]  ;;  %v1868_v18 = vpack.c.bf16 %v460_v14, %v456_v13  ;;  %v1224_v13 = vld [vmem:[#allocation8 + $0x180] sm:$0xff] }
  0x5b   :  { %1793 = vmatpush3.bf16.msra.mxu0 %v1790_v37  ;;  %1733 = vmatprep.mubr.msk.f32.mxu0 %vm93_vm0, %v70_v42  ;;  %v1916_v37 = vpack.c.bf16 %v1183_v34, %v1182_v33  ;;  %v1203_v42 = vld [vmem:[#allocation8 + $0xd8] sm:$0xff]  ;;  %v1920_v43 = vpack.c.bf16 %v1185_v40, %v1184_v39  ;;  %v439_v34 = vld [vmem:[#allocation6 + $0x48] sm:$0xff]  ;;  %v442_v39 = vld [vmem:[#allocation6 + $0x60] sm:$0xff] }
  0x5c   :  { %1795 = vmatprep.subr.bf16.mxu0 %v1794_v41  ;;  %v447_v40 = vld [vmem:[#allocation6 + $0x88] sm:$0xff] }
  0x5d   :  { %v1225_v14 = vld [vmem:[#allocation8 + $0x188] sm:$0xff] }
  0x5e   :  { %1734 = vmatmul.mubr.msk.f32.gmra.mrb[2].mxu0 %vm93_vm0, %v71_v45  ;;  %v1186_v45 = vld [vmem:[#allocation8 + $0x50] sm:$0xff] }
  0x5f   :  { %1797 = vmatpush3.bf16.msra.mxu0 %v1794_v41  ;;  %1752 = vmatprep.mubr.msk.f32.mxu0 %vm93_vm0, %v288_v47  ;;  %v1202_v41 = vld [vmem:[#allocation8 + $0xd0] sm:$0xff]  ;;  %v1204_v47 = vld [vmem:[#allocation8 + $0xe0] sm:$0xff] }
  0x60   :  { %1799 = vmatprep.subr.bf16.mxu0 %v1798_v46  ;;  %v1922_v44 = vpack.c.bf16 %v1203_v42, %v1202_v41  ;;  %v451_v41 = vld [vmem:[#allocation6 + $0xa8] sm:$0xff] }
  0x63   :  { %1801 = vmatpush3.bf16.msra.mxu0 %v1798_v46  ;;  %v1187_v46 = vld [vmem:[#allocation8 + $0x58] sm:$0xff] }
  0x64   :  { %1803 = vmatprep.subr.bf16.mxu0 %v1802_v50 }
  0x67   :  { %1805 = vmatpush3.bf16.msra.mxu0 %v1802_v50  ;;  %v1924_v50 = vpack.c.bf16 %v1187_v46, %v1186_v45  ;;  %v450_v45 = vld [vmem:[#allocation6 + $0xa0] sm:$0xff]  ;;  %v455_v46 = vld [vmem:[#allocation6 + $0xc8] sm:$0xff] }
  0x68   :  { %1903 = vmatprep.subr.bf16.mxu0 %v1902_v15  ;;  %v1828_v15 = vpack.c.bf16 %v481_v11, %v477_v10  ;;  %v461_v10 = vld [vmem:[#allocation6 + $0xf8] sm:$0xff]  ;;  %v1864_v11 = vpack.c.bf16 %v452_v7, %v448_v6  ;;  %v1206_v7 = vld [vmem:[#allocation8 + $0xf0] sm:$0xff] }
  0x6a   :  { %1753 = vmatmul.mubr.msk.f32.vlgmr.msra.gmra.mrb[0].mxu0 %vm93_vm0, %v289_v51  ;;  %v1926_v51 = vpack.c.bf16 %v1205_v48, %v1204_v47  ;;  %v459_v47 = vld [vmem:[#allocation6 + $0xe8] sm:$0xff] }
  0x6b   :  { %1755 = vmatprep.mubr.msk.f32.mxu0 %vm93_vm0, %v290_v52  ;;  %1905 = vmatpush3.bf16.msra.mxu0 %v1904_v19  ;;  %v1188_v52 = vld [vmem:[#allocation8 + $0x60] sm:$0xff] }
  0x6c   :  { %1907 = vmatprep.subr.bf16.mxu0 %v1906_v20  ;;  %v494_v20 = vld [vmem:[#allocation6 + $0x1d8] sm:$0xff] }
  0x6d   :  { %v1834_v23 = vpack.c.bf16 %v498_v21, %v494_v20  ;;  %v884_v20 = vld [vmem:[#allocation6 + $0x200] sm:$0xff] }
  0x6e   :  { %1756 = vmatmul.mubr.msk.f32.gmra.mrb[2].mxu0 %vm93_vm0, %v291_v53  ;;  %v1189_v53 = vld [vmem:[#allocation8 + $0x68] sm:$0xff]  ;;  %v888_v21 = vld [vmem:[#allocation6 + $0x220] sm:$0xff] }
  0x6f   :  { %1909 = vmatpush3.bf16.msra.mxu0 %v1908_v25  ;;  %v1928_v58 = vpack.c.bf16 %v1189_v53, %v1188_v52  ;;  %v497_v25 = vld [vmem:[#allocation6 + $0x1f0] sm:$0xff]  ;;  %v433_v52 = vld [vmem:[#allocation6 + $0x18] sm:$0xff] }
  0x70   :  { %1911 = vmatprep.subr.bf16.mxu0 %v1910_v26  ;;  %v1836_v29 = vpack.c.bf16 %v497_v25, %v493_v24  ;;  %v437_v53 = vld [vmem:[#allocation6 + $0x38] sm:$0xff]  ;;  %v897_v24 = vld [vmem:[#allocation6 + $0x268] sm:$0xff]  ;;  %v1872_v25 = vpack.c.bf16 %v888_v21, %v884_v20 }
  0x73   :  { %1913 = vmatpush3.bf16.msra.mxu0 %v1912_v31  ;;  %v430_v31 = vld [vmem:[#allocation6] sm:$0xff] }
  0x74   :  { %1915 = vmatprep.subr.bf16.mxu0 %v1914_v32  ;;  %v434_v32 = vld [vmem:[#allocation6 + $0x20] sm:$0xff] }
  0x75   :  { %v1840_v36 = vpack.c.bf16 %v434_v32, %v430_v31  ;;  %v1876_v31 = vpack.c.bf16 %v896_v28, %v892_v27  ;;  %v1226_v28 = vld [vmem:[#allocation8 + $0x190] sm:$0xff] }
  0x77   :  { %1917 = vmatpush3.bf16.msra.mxu0 %v1916_v37  ;;  %v1842_v37 = vpack.c.bf16 %v443_v35, %v439_v34  ;;  %v904_v34 = vld [vmem:[#allocation6 + $0x2a0] sm:$0xff]  ;;  %v909_v35 = vld [vmem:[#allocation6 + $0x2c8] sm:$0xff] }
  0x78   :  { %1919 = vmatprep.subr.bf16.mxu0 %v1918_v38  ;;  %v438_v38 = vld [vmem:[#allocation6 + $0x40] sm:$0xff] }
  0x79   :  { %v1844_v42 = vpack.c.bf16 %v442_v39, %v438_v38  ;;  %v908_v39 = vld [vmem:[#allocation6 + $0x2c0] sm:$0xff] }
  0x7b   :  { %1921 = vmatpush3.bf16.msra.mxu0 %v1920_v43  ;;  %v1846_v43 = vpack.c.bf16 %v451_v41, %v447_v40  ;;  %v912_v40 = vld [vmem:[#allocation6 + $0x2e0] sm:$0xff]  ;;  %v887_v41 = vld [vmem:[#allocation6 + $0x218] sm:$0xff] }
  0x7c   :  { %1923 = vmatprep.subr.bf16.mxu0 %v1922_v44  ;;  %v446_v44 = vld [vmem:[#allocation6 + $0x80] sm:$0xff] }
  0x7d   :  { %v1848_v48 = vpack.c.bf16 %v450_v45, %v446_v44  ;;  %v886_v45 = vld [vmem:[#allocation6 + $0x210] sm:$0xff] }
  0x7f   :  { %1925 = vmatpush3.bf16.msra.mxu0 %v1924_v50  ;;  %v454_v50 = vld [vmem:[#allocation6 + $0xc0] sm:$0xff] }
  0x80   :  { %1927 = vmatprep.subr.bf16.mxu0 %v1926_v51  ;;  %v458_v51 = vld [vmem:[#allocation6 + $0xe0] sm:$0xff] }
  0x83   :  { %1929 = vmatpush3.bf16.msra.mxu0 %v1928_v58  ;;  %v441_v58 = vld [vmem:[#allocation6 + $0x58] sm:$0xff] }
 0x13d   :  { %v1754_v54 = vpop.f32.mrb[0].mxu0 }
 0x13e   :  { %v410_v55 = vadd.f32 %v1754_v54, %v1542_v49  ;;  %v379_v56 = vpop.f32.mrb[1].mxu0  ;;  %v1852_v54 = vpack.c.bf16 %v458_v51, %v454_v50  ;;  %v894_v51 = vld [vmem:[#allocation6 + $0x250] sm:$0xff] }
 0x13f   :  { %v409_v57 = vadd.f32 %v1542_v49, %v379_v56  ;;  %v432_v56 = vld [vmem:[#allocation6 + $0x10] sm:$0xff] }
 0x140   :  { %v414_v59 = vmax.f32 %v410_v55, 0.0  ;;  %v1854_v55 = vpack.c.bf16 %v437_v53, %v433_v52  ;;  %v898_v52 = vld [vmem:[#allocation6 + $0x270] sm:$0xff] }
 0x141   :  { %v413_v60 = vmax.f32 %v409_v57, 0.0  ;;  %v1757_v61 = vpop.f32.mrb[2].mxu0  ;;  %v436_v57 = vld [vmem:[#allocation6 + $0x30] sm:$0xff] }
 0x142   :  { %423 = vst.msk [vmem:[#allocation2 + $0x9] sm:$0xff] %vm93_vm0, %v414_v59  ;;  %v412_v62 = vadd.f32 %v1757_v61, %v1542_v49  ;;  %v389_v63 = vpop.f32.mrb[3].mxu0  ;;  %v445_v59 = vld [vmem:[#allocation6 + $0x78] sm:$0xff] }
 0x143   :  { %422 = vst.msk [vmem:[#allocation2 + $0x1] sm:$0xff] %vm93_vm0, %v413_v60  ;;  %v411_v0 = vadd.f32 %v1542_v49, %v389_v63  ;;  %v1850_v49 = vpack.c.bf16 %v459_v47, %v455_v46  ;;  %v1856_v60 = vpack.c.bf16 %v436_v57, %v432_v56  ;;  %v1858_v61 = vpack.c.bf16 %v445_v59, %v441_v58  ;;  %v444_v63 = vld [vmem:[#allocation6 + $0x70] sm:$0xff]  ;;  %v895_v47 = vld [vmem:[#allocation6 + $0x258] sm:$0xff] }
 0x144   :  { %v416_v1 = vmax.f32 %v412_v62, 0.0  ;;  %v440_v62 = vld [vmem:[#allocation6 + $0x50] sm:$0xff]  ;;  %v1892_v56 = vpack.c.bf16 %v898_v52, %v894_v51 }
 0x145   :  { %v415_v3 = vmax.f32 %v411_v0, 0.0  ;;  %v1860_v4 = vpack.c.bf16 %v444_v63, %v440_v62  ;;  %v890_v46 = vld [vmem:[#allocation6 + $0x230] sm:$0xff]  ;;  %v915_v62 = vld [vmem:[#allocation6 + $0x2f8] sm:$0xff] }
 0x146   :  { %425 = vst.msk [vmem:[#allocation2 + $0x21] sm:$0xff] %vm93_vm0, %v416_v1  ;;  %v449_v1 = vld [vmem:[#allocation6 + $0x98] sm:$0xff]  ;;  %v902_v58 = vld [vmem:[#allocation6 + $0x290] sm:$0xff] }
 0x147   :  { %424 = vst.msk [vmem:[#allocation2 + $0x19] sm:$0xff] %vm93_vm0, %v415_v3  ;;  %v453_v3 = vld [vmem:[#allocation6 + $0xb8] sm:$0xff]  ;;  %v906_v59 = vld [vmem:[#allocation6 + $0x2b0] sm:$0xff] }
 0x148   :  { %v1862_v5 = vpack.c.bf16 %v453_v3, %v449_v1  ;;  %v1896_v63 = vpack.c.bf16 %v906_v59, %v902_v58  ;;  %v910_v1 = vld [vmem:[#allocation6 + $0x2d0] sm:$0xff] }
 0x149   :  { %v463_v19 = vld [vmem:[#allocation2 + $0x9] sm:$0xff]  ;;  %v914_v3 = vld [vmem:[#allocation6 + $0x2f0] sm:$0xff] }
 0x14a   :  { %v462_v12 = vld [vmem:[#allocation2 + $0x1] sm:$0xff] }
 0x14b   :  { %1543 = vmatmul.mubr.msk.f32.vlgmr.msra.gmra.mrb[0].mxu1 %vm93_vm0, %v462_v12  ;;  %v426_v0 = vld [vmem:[#allocation2] sm:$0xff] }
 0x14c   :  { %1825 = vmatpush1.bf16.msra.mxu1 %v1824_v8  ;;  %581 = vmatprep.mubr.f32.mxu1 %v2133_v2  ;;  %v427_v8 = vld [vmem:[#allocation2 + $0x8] sm:$0xff] }
 0x14d   :  { %1827 = vmatprep.subr.bf16.mxu1 %v1826_v9  ;;  %v465_v33 = vld [vmem:[#allocation2 + $0x21] sm:$0xff] }
 0x14e   :  { %v464_v26 = vld [vmem:[#allocation2 + $0x19] sm:$0xff]  ;;  %v457_v9 = vld [vmem:[#allocation6 + $0xd8] sm:$0xff] }
 0x14f   :  { %1544 = vmatmul.mubr.msk.f32.gmra.mrb[2].mxu1 %vm93_vm0, %v463_v19  ;;  %v879_v53 = vld [vmem:[#allocation2 + $0x2] sm:$0xff] }
 0x150   :  { %1829 = vmatpush1.bf16.msra.mxu1 %v1828_v15  ;;  %587 = vmatprep.mubr.f32.mxu1 %v2133_v2  ;;  %v428_v15 = vld [vmem:[#allocation2 + $0x18] sm:$0xff]  ;;  %v882_v6 = vld [vmem:[#allocation2 + $0x22] sm:$0xff] }
 0x151   :  { %1831 = vmatprep.subr.bf16.mxu1 %v1830_v16  ;;  %v885_v16 = vld [vmem:[#allocation6 + $0x208] sm:$0xff] }
 0x153   :  { %1545 = vmatmul.mubr.msk.f32.gmra.mrb[4].mxu1 %vm93_vm0, %v464_v26 }
 0x154   :  { %1833 = vmatpush1.bf16.msra.mxu1 %v1832_v22  ;;  %593 = vmatprep.mubr.f32.mxu1 %v2133_v2  ;;  %v429_v22 = vld [vmem:[#allocation2 + $0x20] sm:$0xff] }
 0x155   :  { %1835 = vmatprep.subr.bf16.mxu1 %v1834_v23  ;;  %v893_v23 = vld [vmem:[#allocation6 + $0x248] sm:$0xff] }
 0x157   :  { %1546 = vmatmul.mubr.msk.f32.gmra.mrb[6].mxu1 %vm93_vm0, %v465_v33 }
 0x158   :  { %1837 = vmatpush1.bf16.msra.mxu1 %v1836_v29  ;;  %664 = vmatprep.mubr.f32.mxu1 %v2133_v2  ;;  %v901_v29 = vld [vmem:[#allocation6 + $0x288] sm:$0xff] }
 0x159   :  { %1839 = vmatprep.subr.bf16.mxu1 %v1838_v30  ;;  %v905_v30 = vld [vmem:[#allocation6 + $0x2a8] sm:$0xff] }
 0x15a   :  { %v1878_v32 = vpack.c.bf16 %v905_v30, %v901_v29  ;;  %v1227_v29 = vld [vmem:[#allocation8 + $0x198] sm:$0xff] }
 0x15b   :  { %1547 = vmatmul.mubr.msk.f32.vlgmr.msra.gmra.mrb[8].mxu1 %vm93_vm0, %v462_v12  ;;  %v1866_v12 = vpack.c.bf16 %v461_v10, %v457_v9  ;;  %v1190_v10 = vld [vmem:[#allocation8 + $0x70] sm:$0xff] }
 0x15c   :  { %1841 = vmatpush1.bf16.msra.mxu1 %v1840_v36  ;;  %670 = vmatprep.mubr.f32.mxu1 %v2133_v2  ;;  %v913_v36 = vld [vmem:[#allocation6 + $0x2e8] sm:$0xff] }
 0x15d   :  { %1843 = vmatprep.subr.bf16.mxu1 %v1842_v37  ;;  %v1882_v38 = vpack.c.bf16 %v913_v36, %v909_v35  ;;  %v1938_v36 = vpack.c.bf16 %v1227_v29, %v1226_v28 }
 0x15f   :  { %1548 = vmatmul.mubr.msk.f32.gmra.mrb[10].mxu1 %vm93_vm0, %v463_v19  ;;  %v1870_v19 = vpack.c.bf16 %v889_v17, %v885_v16  ;;  %v1124_v16 = vlaneseq }
 0x160   :  { %1845 = vmatpush1.bf16.msra.mxu1 %v1844_v42  ;;  %676 = vmatprep.mubr.f32.mxu1 %v2133_v2  ;;  %v891_v42 = vld [vmem:[#allocation6 + $0x238] sm:$0xff] }
 0x161   :  { %1847 = vmatprep.subr.bf16.mxu1 %v1846_v43  ;;  %v1884_v43 = vpack.c.bf16 %v912_v40, %v908_v39  ;;  %v1886_v44 = vpack.c.bf16 %v891_v42, %v887_v41  ;;  %v2319_v17 = vshrl.u32 %v1124_v16, 7  ;;  %v1228_v40 = vld [vmem:[#allocation8 + $0x1a0] sm:$0xff]  ;;  %v1229_v41 = vld [vmem:[#allocation8 + $0x1a8] sm:$0xff] }
 0x163   :  { %1549 = vmatmul.mubr.msk.f32.gmra.mrb[12].mxu1 %vm93_vm0, %v464_v26  ;;  %v1874_v26 = vpack.c.bf16 %v897_v24, %v893_v23  ;;  %v1138_v52 = vsub.s32 3, %v2319_v17  ;;  %v1134_v28 = vsub.s32 2, %v2319_v17 }
 0x164   :  { %1849 = vmatpush1.bf16.msra.mxu1 %v1848_v48  ;;  %682 = vmatprep.mubr.f32.mxu1 %v2133_v2  ;;  %v899_v48 = vld [vmem:[#allocation6 + $0x278] sm:$0xff] }
 0x165   :  { %1851 = vmatprep.subr.bf16.mxu1 %v1850_v49  ;;  %v1888_v49 = vpack.c.bf16 %v890_v46, %v886_v45  ;;  %v1890_v50 = vpack.c.bf16 %v899_v48, %v895_v47  ;;  %v1942_v48 = vpack.c.bf16 %v1229_v41, %v1228_v40  ;;  %v1222_v40 = vld [vmem:[#allocation8 + $0x170] sm:$0xff]  ;;  %v1223_v41 = vld [vmem:[#allocation8 + $0x178] sm:$0xff] }
 0x167   :  { %1550 = vmatmul.mubr.msk.f32.gmra.mrb[14].mxu1 %vm93_vm0, %v465_v33  ;;  %v900_v33 = vld [vmem:[#allocation6 + $0x280] sm:$0xff] }
 0x168   :  { %1853 = vmatpush1.bf16.msra.mxu1 %v1852_v54  ;;  %765 = vmatprep.mubr.f32.mxu1 %v2133_v2  ;;  %v1880_v37 = vpack.c.bf16 %v904_v34, %v900_v33  ;;  %v903_v54 = vld [vmem:[#allocation6 + $0x298] sm:$0xff] }
 0x169   :  { %1855 = vmatprep.subr.bf16.mxu1 %v1854_v55  ;;  %v907_v55 = vld [vmem:[#allocation6 + $0x2b8] sm:$0xff] }
 0x16a   :  { %v1894_v57 = vpack.c.bf16 %v907_v55, %v903_v54  ;;  %v1231_v54 = vld [vmem:[#allocation8 + $0x1b8] sm:$0xff] }
 0x16b   :  { %1551 = vmatmul.mubr.msk.f32.vlgmr.msra.gmra.mrb[0].mxu1 %vm93_vm0, %v426_v0 }
 0x16c   :  { %1857 = vmatpush1.bf16.msra.mxu1 %v1856_v60  ;;  %771 = vmatprep.mubr.f32.mxu1 %v2133_v2  ;;  %v880_v60 = vld [vmem:[#allocation2 + $0xa] sm:$0xff] }
 0x16d   :  { %1859 = vmatprep.subr.bf16.mxu1 %v1858_v61  ;;  %v911_v61 = vld [vmem:[#allocation6 + $0x2d8] sm:$0xff] }
 0x16f   :  { %1552 = vmatmul.mubr.msk.f32.gmra.mrb[2].mxu1 %vm93_vm0, %v427_v8 }
 0x170   :  { %1861 = vmatpush1.bf16.msra.mxu1 %v1860_v4  ;;  %777 = vmatprep.mubr.f32.mxu1 %v2133_v2  ;;  %v881_v4 = vld [vmem:[#allocation2 + $0x1a] sm:$0xff] }
 0x171   :  { %1863 = vmatprep.subr.bf16.mxu1 %v1862_v5  ;;  %v1900_v5 = vpack.c.bf16 %v914_v3, %v910_v1  ;;  %v1232_v3 = vld [vmem:[#allocation8 + $0x1c0] sm:$0xff] }
 0x173   :  { %1553 = vmatmul.mubr.msk.f32.gmra.mrb[4].mxu1 %vm93_vm0, %v428_v15 }
 0x174   :  { %1865 = vmatpush1.bf16.msra.mxu1 %v1864_v11  ;;  %783 = vmatprep.mubr.f32.mxu1 %v2133_v2  ;;  %v1191_v11 = vld [vmem:[#allocation8 + $0x78] sm:$0xff] }
 0x175   :  { %1867 = vmatprep.subr.bf16.mxu1 %v1866_v12  ;;  %v1932_v12 = vpack.c.bf16 %v1191_v11, %v1190_v10  ;;  %v1216_v11 = vld [vmem:[#allocation8 + $0x140] sm:$0xff] }
 0x177   :  { %1554 = vmatmul.mubr.msk.f32.gmra.mrb[6].mxu1 %vm93_vm0, %v429_v22 }
 0x178   :  { %1869 = vmatpush1.bf16.msra.mxu1 %v1868_v18  ;;  %854 = vmatprep.mubr.f32.mxu1 %v2133_v2  ;;  %v1126_v18 = vsub.s32 0, %v2319_v17 }
 0x179   :  { %1871 = vmatprep.subr.bf16.mxu1 %v1870_v19  ;;  %v1130_v19 = vsub.s32 1, %v2319_v17 }
 0x17b   :  { %1555 = vmatmul.mubr.msk.f32.vlgmr.msra.gmra.mrb[8].mxu1 %vm93_vm0, %v426_v0  ;;  %v1898_v0 = vpack.c.bf16 %v915_v62, %v911_v61  ;;  %v1214_v62 = vld [vmem:[#allocation8 + $0x130] sm:$0xff] }
 0x17c   :  { %1873 = vmatpush1.bf16.msra.mxu1 %v1872_v25  ;;  %860 = vmatprep.mubr.f32.mxu1 %v2133_v2  ;;  %v1208_v25 = vld [vmem:[#allocation8 + $0x100] sm:$0xff] }
 0x17d   :  { %1875 = vmatprep.subr.bf16.mxu1 %v1874_v26  ;;  %v1209_v26 = vld [vmem:[#allocation8 + $0x108] sm:$0xff] }
 0x17f   :  { %1556 = vmatmul.mubr.msk.f32.gmra.mrb[10].mxu1 %vm93_vm0, %v427_v8  ;;  %v1207_v8 = vld [vmem:[#allocation8 + $0xf8] sm:$0xff] }
 0x180   :  { %1877 = vmatpush1.bf16.msra.mxu1 %v1876_v31  ;;  %866 = vmatprep.mubr.f32.mxu1 %v2133_v2  ;;  %v1930_v9 = vpack.c.bf16 %v1207_v8, %v1206_v7 }
 0x181   :  { %1879 = vmatprep.subr.bf16.mxu1 %v1878_v32  ;;  %v1936_v32 = vpack.c.bf16 %v1209_v26, %v1208_v25  ;;  %v1237_v25 = vld [vmem:[#allocation8 + $0x1e8] sm:$0xff] }
 0x182   :  { %1931 = vmatprep.subr.bf16.mxu0 %v1930_v9 }
 0x183   :  { %1557 = vmatmul.mubr.msk.f32.gmra.mrb[12].mxu1 %vm93_vm0, %v428_v15  ;;  %1933 = vmatpush3.bf16.msra.mxu0 %v1932_v12  ;;  %v1934_v15 = vpack.c.bf16 %v1225_v14, %v1224_v13  ;;  %v1217_v12 = vld [vmem:[#allocation8 + $0x148] sm:$0xff]  ;;  %v1234_v14 = vld [vmem:[#allocation8 + $0x1d0] sm:$0xff] }
 0x184   :  { %1881 = vmatpush1.bf16.msra.mxu1 %v1880_v37  ;;  %872 = vmatprep.mubr.f32.mxu1 %v2133_v2  ;;  %v1210_v37 = vld [vmem:[#allocation8 + $0x110] sm:$0xff] }
 0x185   :  { %1883 = vmatprep.subr.bf16.mxu1 %v1882_v38  ;;  %1935 = vmatprep.subr.bf16.mxu0 %v1934_v15  ;;  %v1211_v38 = vld [vmem:[#allocation8 + $0x118] sm:$0xff] }
 0x186   :  { %v1235_v15 = vld [vmem:[#allocation8 + $0x1d8] sm:$0xff] }
 0x187   :  { %1558 = vmatmul.mubr.msk.f32.gmra.mrb[14].mxu1 %vm93_vm0, %v429_v22 }
 0x188   :  { %1885 = vmatpush1.bf16.msra.mxu1 %v1884_v43  ;;  %992 = vmatprep.mubr.f32.mxu1 %v2133_v2 }
 0x189   :  { %1887 = vmatprep.subr.bf16.mxu1 %v1886_v44  ;;  %v1940_v44 = vpack.c.bf16 %v1211_v38, %v1210_v37 }
 0x18b   :  { %1559 = vmatmul.mubr.msk.f32.vlgmr.msra.gmra.mrb[0].mxu1 %vm93_vm0, %v879_v53 }
 0x18c   :  { %1889 = vmatpush1.bf16.msra.mxu1 %v1888_v49  ;;  %998 = vmatprep.mubr.f32.mxu1 %v2133_v2  ;;  %v1212_v49 = vld [vmem:[#allocation8 + $0x120] sm:$0xff] }
 0x18d   :  { %1891 = vmatprep.subr.bf16.mxu1 %v1890_v50  ;;  %v1213_v50 = vld [vmem:[#allocation8 + $0x128] sm:$0xff] }
 0x18f   :  { %1560 = vmatmul.mubr.msk.f32.gmra.mrb[2].mxu1 %vm93_vm0, %v880_v60 }
 0x190   :  { %1893 = vmatpush1.bf16.msra.mxu1 %v1892_v56  ;;  %1004 = vmatprep.mubr.f32.mxu1 %v2133_v2 }
 0x191   :  { %1895 = vmatprep.subr.bf16.mxu1 %v1894_v57  ;;  %v1944_v57 = vpack.c.bf16 %v1213_v50, %v1212_v49 }
 0x193   :  { %1561 = vmatmul.mubr.msk.f32.gmra.mrb[4].mxu1 %vm93_vm0, %v881_v4 }
 0x194   :  { %1897 = vmatpush1.bf16.msra.mxu1 %v1896_v63  ;;  %1010 = vmatprep.mubr.f32.mxu1 %v2133_v2  ;;  %v1215_v63 = vld [vmem:[#allocation8 + $0x138] sm:$0xff] }
 0x195   :  { %1899 = vmatprep.subr.bf16.mxu1 %v1898_v0  ;;  %v1948_v7 = vpack.c.bf16 %v1215_v63, %v1214_v62 }
 0x197   :  { %1562 = vmatmul.mubr.msk.f32.gmra.mrb[6].mxu1 %vm93_vm0, %v882_v6 }
 0x198   :  { %1901 = vmatpush1.bf16.msra.mxu1 %v1900_v5  ;;  %1081 = vmatprep.mubr.f32.mxu1 %v2133_v2 }
 0x19b   :  { %1563 = vmatmul.mubr.msk.f32.vlgmr.msra.gmra.mrb[8].mxu1 %vm93_vm0, %v879_v53  ;;  %v1230_v53 = vld [vmem:[#allocation8 + $0x1b0] sm:$0xff] }
 0x19c   :  { %1087 = vmatprep.mubr.f32.mxu1 %v2133_v2  ;;  %v1946_v61 = vpack.c.bf16 %v1231_v54, %v1230_v53 }
 0x19f   :  { %1564 = vmatmul.mubr.msk.f32.gmra.mrb[10].mxu1 %vm93_vm0, %v880_v60 }
 0x1a0   :  { %1093 = vmatprep.mubr.f32.mxu1 %v2133_v2 }
 0x1a3   :  { %1565 = vmatmul.mubr.msk.f32.gmra.mrb[12].mxu1 %vm93_vm0, %v881_v4  ;;  %v1233_v4 = vld [vmem:[#allocation8 + $0x1c8] sm:$0xff] }
 0x1a4   :  { %1099 = vmatprep.mubr.f32.mxu1 %v2133_v2  ;;  %v2325_v2 = vld [vmem:[%s2365_s4] sm:$0xf]  ;;  %v1950_v10 = vpack.c.bf16 %v1233_v4, %v1232_v3 }
 0x1a5   :  { %v1127_v20 = vrot.slane %v2325_v2, %v1126_v18  ;;  %v1131_v21 = vrot.slane %v2325_v2, %v1130_v19  ;;  %v2332_v1 = vrot.slane %v2325_v2, %v1138_v52  ;;  %v1952_v19 = vpack.c.bf16 %v1217_v12, %v1216_v11 }
 0x1a6   :  { %v1135_v37 = vrot.slane %v2325_v2, %v1134_v28 }
 0x1a7   :  { %1566 = vmatmul.mubr.msk.f32.gmra.mrb[14].mxu1 %vm93_vm0, %v882_v6 }
 0x25e   :  { %v994_v22 = vpop.f32.mrb[0].mxu1 }
 0x25f   :  { %v1144_v23 = vadd.f32 %v1127_v20, %v994_v22  ;;  %v996_v24 = vpop.f32.mrb[1].mxu1  ;;  %v1218_v22 = vld [vmem:[#allocation8 + $0x150] sm:$0xff] }
 0x260   :  { %v1145_v27 = vadd.f32 %v1131_v21, %v996_v24  ;;  %v1236_v24 = vld [vmem:[#allocation8 + $0x1e0] sm:$0xff] }
 0x261   :  { %v1160_v33 = vmax.f32 %v1144_v23, 0.0  ;;  %v1219_v23 = vld [vmem:[#allocation8 + $0x158] sm:$0xff] }
 0x262   :  { %v1161_v30 = vmax.f32 %v1145_v27, 0.0  ;;  %v1000_v31 = vpop.f32.mrb[2].mxu1  ;;  %v1956_v27 = vpack.c.bf16 %v1219_v23, %v1218_v22 }
 0x263   :  { %v1148_v34 = vadd.f32 %v1127_v20, %v1000_v31  ;;  %v1002_v35 = vpop.f32.mrb[3].mxu1  ;;  %v1220_v31 = vld [vmem:[#allocation8 + $0x160] sm:$0xff] }
 0x264   :  { %v1149_v39 = vadd.f32 %v1131_v21, %v1002_v35  ;;  %1304 = vmatprep.mubr.f32.mxu0 %v1161_v30  ;;  %v1958_v30 = vpack.c.bf16 %v1237_v25, %v1236_v24 }
 0x265   :  { %1305 = vmatmul.mubr.f32.vlgmr.msra.gmra.mrb[4].mxu0 %v1160_v33  ;;  %v1164_v45 = vmax.f32 %v1148_v34, 0.0  ;;  %v1238_v33 = vld [vmem:[#allocation8 + $0x1f0] sm:$0xff]  ;;  %v1239_v34 = vld [vmem:[#allocation8 + $0x1f8] sm:$0xff] }
 0x266   :  { %v1165_v42 = vmax.f32 %v1149_v39, 0.0  ;;  %1937 = vmatpush3.bf16.msra.mxu0 %v1936_v32  ;;  %v1006_v43 = vpop.f32.mrb[4].mxu1  ;;  %v1221_v32 = vld [vmem:[#allocation8 + $0x168] sm:$0xff]  ;;  %v1962_v39 = vpack.c.bf16 %v1239_v34, %v1238_v33 }
 0x267   :  { %v1152_v46 = vadd.f32 %v1127_v20, %v1006_v43  ;;  %v1008_v47 = vpop.f32.mrb[5].mxu1  ;;  %1939 = vmatprep.subr.bf16.mxu0 %v1938_v36  ;;  %v1960_v36 = vpack.c.bf16 %v1221_v32, %v1220_v31 }
 0x268   :  { %v1153_v51 = vadd.f32 %v1131_v21, %v1008_v47  ;;  %1309 = vmatprep.mubr.f32.mxu0 %v1165_v42  ;;  %v1964_v42 = vpack.c.bf16 %v1223_v41, %v1222_v40 }
 0x269   :  { %1310 = vmatmul.mubr.f32.gmra.mrb[6].mxu0 %v1164_v45  ;;  %v1168_v58 = vmax.f32 %v1152_v46, 0.0 }
 0x26a   :  { %v1169_v55 = vmax.f32 %v1153_v51, 0.0  ;;  %1941 = vmatpush3.bf16.msra.mxu0 %v1940_v44  ;;  %v1012_v56 = vpop.f32.mrb[6].mxu1 }
 0x26b   :  { %v1156_v59 = vadd.f32 %v1127_v20, %v1012_v56  ;;  %v1014_v60 = vpop.f32.mrb[7].mxu1  ;;  %1943 = vmatprep.subr.bf16.mxu0 %v1942_v48 }
 0x26c   :  { %v1157_v0 = vadd.f32 %v1131_v21, %v1014_v60  ;;  %1314 = vmatprep.mubr.f32.mxu0 %v1169_v55  ;;  %v1954_v21 = vpack.c.bf16 %v1235_v15, %v1234_v14 }
 0x26d   :  { %1315 = vmatmul.mubr.f32.gmra.mrb[8].mxu0 %v1168_v58  ;;  %v1172_v8 = vmax.f32 %v1156_v59, 0.0 }
 0x26e   :  { %v1173_v5 = vmax.f32 %v1157_v0, 0.0  ;;  %1945 = vmatpush3.bf16.msra.mxu0 %v1944_v57  ;;  %v1083_v6 = vpop.f32.mrb[8].mxu1 }
 0x26f   :  { %v1085_v9 = vpop.f32.mrb[9].mxu1  ;;  %1947 = vmatprep.subr.bf16.mxu0 %v1946_v61  ;;  %v1146_v17 = vadd.f32 %v1135_v37, %v1083_v6 }
 0x270   :  { %v1147_v13 = vadd.f32 %v2332_v1, %v1085_v9  ;;  %1319 = vmatprep.mubr.f32.mxu0 %v1173_v5 }
 0x271   :  { %1320 = vmatmul.mubr.f32.gmra.mrb[10].mxu0 %v1172_v8  ;;  %v1162_v44 = vmax.f32 %v1146_v17, 0.0 }
 0x272   :  { %v1163_v16 = vmax.f32 %v1147_v13, 0.0  ;;  %1949 = vmatpush3.bf16.msra.mxu0 %v1948_v7  ;;  %v1089_v18 = vpop.f32.mrb[10].mxu1 }
 0x273   :  { %v1091_v20 = vpop.f32.mrb[11].mxu1  ;;  %1951 = vmatprep.subr.bf16.mxu0 %v1950_v10  ;;  %v1150_v45 = vadd.f32 %v1135_v37, %v1089_v18 }
 0x274   :  { %1389 = vmatprep.mubr.f32.mxu0 %v1163_v16  ;;  %v1151_v43 = vadd.f32 %v2332_v1, %v1091_v20 }
 0x275   :  { %v1166_v2 = vmax.f32 %v1150_v45, 0.0 }
 0x276   :  { %1953 = vmatpush3.bf16.msra.mxu0 %v1952_v19  ;;  %v1095_v26 = vpop.f32.mrb[12].mxu1  ;;  %v1167_v46 = vmax.f32 %v1151_v43, 0.0 }
 0x277   :  { %v1097_v29 = vpop.f32.mrb[13].mxu1  ;;  %1955 = vmatprep.subr.bf16.mxu0 %v1954_v21  ;;  %v1154_v48 = vadd.f32 %v1135_v37, %v1095_v26 }
 0x278   :  { %v1155_v47 = vadd.f32 %v2332_v1, %v1097_v29  ;;  %v1567_v29 = vld [vmem:[%s2367_s6] ss:$0 sm:$0xff]  ;;  %s2134_s6 = smov 48  }
 0x279   :  { %v1170_v51 = vmax.f32 %v1154_v48, 0.0 }
 0x27a   :  { %1957 = vmatpush3.bf16.msra.mxu0 %v1956_v27  ;;  %v1101_v35 = vpop.f32.mrb[14].mxu1  ;;  %v1171_v49 = vmax.f32 %v1155_v47, 0.0 }
 0x27b   :  { %v1103_v38 = vpop.f32.mrb[15].mxu1  ;;  %1959 = vmatprep.subr.bf16.mxu0 %v1958_v30  ;;  %v1158_v52 = vadd.f32 %v1135_v37, %v1101_v35 }
 0x27c   :  { %v1159_v50 = vadd.f32 %v2332_v1, %v1103_v38 }
 0x27d   :  { %v1174_v54 = vmax.f32 %v1158_v52, 0.0 }
 0x27e   :  { %1961 = vmatpush3.bf16.msra.mxu0 %v1960_v36  ;;  %v1175_v53 = vmax.f32 %v1159_v50, 0.0 }
 0x27f   :  { %1963 = vmatprep.subr.bf16.mxu0 %v1962_v39 }
 0x282   :  { %1965 = vmatpush3.bf16.msra.mxu0 %v1964_v42 }
 0x285   :  { %1390 = vmatmul.mubr.f32.vlgmr.msra.gmra.mrb[12].mxu0 %v1162_v44 }
 0x286   :  { %1394 = vmatprep.mubr.f32.mxu0 %v1167_v46 }
 0x289   :  { %1395 = vmatmul.mubr.f32.gmra.mrb[14].mxu0 %v1166_v2 }
 0x28a   :  { %1399 = vmatprep.mubr.f32.mxu0 %v1171_v49 }
 0x28d   :  { %1400 = vmatmul.mubr.f32.gmra.mrb[16].mxu0 %v1170_v51 }
 0x28e   :  { %1404 = vmatprep.mubr.f32.mxu0 %v1175_v53 }
 0x291   :  { %1405 = vmatmul.mubr.f32.gmra.mrb[18].mxu0 %v1174_v54 }
 0x338   :  { %v1636_v55 = vpop.f32.mrb[4].mxu0 }
 0x339   :  { %v1637_v56 = vpop.f32.mrb[5].mxu0 }
 0x33a   :  { %v1638_v57 = vadd.f32 %v1637_v56, %v1636_v55 }
 0x33c   :  { %v1639_v58 = vpop.f32.mrb[6].mxu0 }
 0x33d   :  { %v1640_v59 = vpop.f32.mrb[7].mxu0 }
 0x33e   :  { %v1641_v60 = vadd.f32 %v1640_v59, %v1639_v58 }
 0x340   :  { %v1642_v61 = vpop.f32.mrb[8].mxu0 }
 0x341   :  { %v1643_v62 = vpop.f32.mrb[9].mxu0 }
 0x342   :  { %v1644_v63 = vadd.f32 %v1643_v62, %v1642_v61 }
 0x344   :  { %v1645_v0 = vpop.f32.mrb[10].mxu0 }
 0x345   :  { %v1646_v1 = vpop.f32.mrb[11].mxu0 }
 0x346   :  { %v1647_v3 = vadd.f32 %v1646_v1, %v1645_v0 }
 0x358   :  { %v1680_v4 = vpop.f32.mrb[12].mxu0 }
 0x359   :  { %v1681_v5 = vpop.f32.mrb[13].mxu0 }
 0x35a   :  { %v1682_v6 = vadd.f32 %v1681_v5, %v1680_v4 }
 0x35c   :  { %v1392_v7 = vadd.f32 %v1682_v6, %v1638_v57  ;;  %v1683_v8 = vpop.f32.mrb[14].mxu0 }
 0x35d   :  { %v1684_v9 = vpop.f32.mrb[15].mxu0 }
 0x35e   :  { %v1685_v10 = vadd.f32 %v1684_v9, %v1683_v8 }
 0x360   :  { %v1397_v11 = vadd.f32 %v1685_v10, %v1641_v60  ;;  %v1686_v12 = vpop.f32.mrb[16].mxu0 }
 0x361   :  { %v1687_v13 = vpop.f32.mrb[17].mxu0 }
 0x362   :  { %v1410_v14 = vadd.f32 %v1397_v11, %v1392_v7  ;;  %v1688_v15 = vadd.f32 %v1687_v13, %v1686_v12 }
 0x364   :  { %v1411_v16 = vrot.slane %v1410_v14, 4  ;;  %v1402_v18 = vadd.f32 %v1688_v15, %v1644_v63  ;;  %v1689_v19 = vpop.f32.mrb[18].mxu0 }
 0x365   :  { %v1690_v20 = vpop.f32.mrb[19].mxu0 }
 0x366   :  { %v1412_v21 = vadd.f32 %v1411_v16, %v1410_v14  ;;  %v1691_v22 = vadd.f32 %v1690_v20, %v1689_v19 }
 0x368   :  { %v1413_v23 = vrot.slane %v1412_v21, 2  ;;  %v1407_v24 = vadd.f32 %v1691_v22, %v1647_v3 }
 0x36a   :  { %v1414_v25 = vadd.f32 %v1413_v23, %v1412_v21  ;;  %v1417_v26 = vadd.f32 %v1407_v24, %v1402_v18 }
 0x36c   :  { %v1415_v27 = vrot.slane %v1414_v25, 1  ;;  %v1418_v28 = vrot.slane %v1417_v26, 4 }
 0x36e   :  { %v1416_v30 = vadd.f32 %v1415_v27, %v1414_v25  ;;  %v1419_v31 = vadd.f32 %v1418_v28, %v1417_v26 }
 0x370   :  { %v1431_v32 = vadd.f32 %v1567_v29, %v1416_v30  ;;  %v1420_v33 = vrot.slane %v1419_v31, 2 }
 0x372   :  { %v1442_v34 = vmin.f32 %v1431_v32, 20.0  ;;  %v1421_v35 = vadd.f32 %v1420_v33, %v1419_v31  ;;  %vm1440_vm7 = vcmp.gt.f32.partialorder %v1431_v32, 20.0 }
 0x374   :  { %v1444_v36 = vmul.f32 1.442695, %v1442_v34  ;;  %v1422_v37 = vrot.slane %v1421_v35, 1 }
 0x376   :  { %2016 = vpow2.f32 %v1444_v36  ;;  %v1423_v38 = vadd.f32 %v1422_v37, %v1421_v35 }
 0x378   :  { %v1432_v39 = vadd.f32 %v1567_v29, %v1423_v38 }
 0x37a   :  { %v1443_v40 = vmin.f32 %v1432_v39, 20.0  ;;  %v1435_v41 = vrot.slane %v1432_v39, 7  ;;  %vm1441_vm6 = vcmp.gt.f32.partialorder %v1432_v39, 20.0 }
 0x37c   :  { %v1446_v42 = vmul.f32 1.442695, %v1443_v40  ;;  %v1437_v17 = vsel %vm1436_vm2, %v1435_v41, %v1431_v32 }
 0x37d   :  { %v1476_v43 = vsel %vm1475_vm3, %v1437_v17, -inf  ;;  %1439 = vst [vmem:[#allocation9] sm:$0x3] %v1437_v17 }
 0x37e   :  { %2018 = vpow2.f32 %v1446_v42  ;;  %1477 = vmax.xlane.f32.xlu0 %v1476_v43 }
 0x380   :  { %v2017_v44 = vpop.eup %2016 }
 0x381   :  { %v1448_v45 = vadd.f32 1.0, %v2017_v44  ;;  %v1451_v2 = vmul.f32 -0.5, %v2017_v44  ;;  %v1454_v52 = vand.u32 2147483647, %v2017_v44 }
 0x383   :  { %2020 = vlog2.f32 %v1448_v45  ;;  %v1452_v50 = vadd.f32 1.0, %v1451_v2  ;;  %vm1455_vm4 = vcmp.lt.f32.partialorder %v1454_v52, 0.0004427343 }
 0x385   :  { %v1453_v56 = vmul.f32 %v2017_v44, %v1452_v50 }
 0x388   :  { %v2019_v46 = vpop.eup %2018 }
 0x389   :  { %v1457_v47 = vadd.f32 1.0, %v2019_v46  ;;  %v1460_v48 = vmul.f32 -0.5, %v2019_v46  ;;  %v1463_v53 = vand.u32 2147483647, %v2019_v46 }
 0x38b   :  { %2022 = vlog2.f32 %v1457_v47  ;;  %v1461_v51 = vadd.f32 1.0, %v1460_v48  ;;  %vm1464_vm5 = vcmp.lt.f32.partialorder %v1463_v53, 0.0004427343 }
 0x38d   :  { %v2021_v49 = vpop.eup %2020  ;;  %v1462_v58 = vmul.f32 %v2019_v46, %v1461_v51 }
 0x38e   :  { %v1450_v54 = vmul.f32 0.6931472, %v2021_v49 }
 0x390   :  { %v1456_v59 = vsel %vm1455_vm4, %v1453_v56, %v1450_v54 }
 0x391   :  { %v1466_v63 = vsel %vm1440_vm7, %v1431_v32, %v1456_v59 }
 0x395   :  { %v2023_v55 = vpop.eup %2022 }
 0x396   :  { %v1459_v57 = vmul.f32 0.6931472, %v2023_v55 }
 0x398   :  { %v1465_v60 = vsel %vm1464_vm5, %v1462_v58, %v1459_v57 }
 0x399   :  { %v1467_v61 = vsel %vm1441_vm6, %v1432_v39, %v1465_v60 }
 0x39a   :  { %v1470_v62 = vrot.slane %v1467_v61, 7 }
 0x39c   :  { %v1471_v0 = vsel %vm1436_vm2, %v1470_v62, %v1466_v63 }
 0x39d   :  { %1474 = vst.msk [vmem:[#allocation9] sm:$0x3] %vm1473_vm8, %v1471_v0 }
 0x40b   :  { %v1478_v1 = vpop.xlane.xlu0 %1477 }
 0x40c   :  { %v1480_v3 = vrot.slane %v1478_v1, 1  ;;  %v1483_v4 = vsub.f32 %v1431_v32, %v1478_v1 }
 0x40e   :  { %v1484_v5 = vsub.f32 %v1432_v39, %v1480_v3  ;;  %v1485_v6 = vmul.f32 1.442695, %v1483_v4 }
 0x410   :  { %v1487_v7 = vmul.f32 1.442695, %v1484_v5 }
 0x412   :  { %2024 = vpow2.f32 %v1487_v7 }
 0x413   :  { %2026 = vpow2.f32 %v1485_v6 }
 0x41c   :  { %v2025_v8 = vpop.eup %2024 }
 0x41d   :  { %v1491_v9 = vrot.slane %v2025_v8, 7  ;;  %v2027_v10 = vpop.eup %2026 }
 0x41f   :  { %v1492_v11 = vsel %vm1436_vm2, %v1491_v9, %v2027_v10 }
 0x420   :  { %1493 = vrot.lane.b32.xlu0 %v1492_v11, %s2134_s6 }
 0x492   :  { %v1494_v12 = vpop.permute.xlu0 %1493 }
 0x493   :  { %v1497_v13 = vsel %vm1496_vm9, %v1494_v12, 0.0 }
 0x494   :  { %1498 = vadd.xlane.f32.xlu1 %v1497_v13 }
 0x521   :  { %v1499_v14 = vpop.xlane.xlu1 %1498 }
 0x522   :  { %v1501_v15 = vrot.slane %v1499_v14, 1  ;;  %2028 = vrcp.f32 %v1499_v14 }
 0x524   :  { %2030 = vrcp.f32 %v1501_v15 }
 0x52c   :  { %v2029_v16 = vpop.eup %2028 }
 0x52d   :  { %v1505_v20 = vmul.f32 %v2029_v16, %v2027_v10 }
 0x52e   :  { %v2031_v18 = vpop.eup %2030 }
 0x52f   :  { %v1507_v19 = vmul.f32 %v2031_v18, %v2025_v8 }
 0x531   :  { %v1510_v21 = vrot.slane %v1507_v19, 7 }
 0x533   :  { %v1511_v22 = vsel %vm1436_vm2, %v1510_v21, %v1505_v20 }
 0x534   :  { %1513 = vst.msk [vmem:[#allocation9] sm:$0x3] %vm1475_vm3, %v1511_v22 }
 0x535   :  { %2109 = shalt.err (!%p2106_p0)
}
 0x536   :  { %s2110_s21 = scalar_lea.hbm %s2368_s7, 32 }
 0x537   :  { %p2111_p1 = scmp.ne.s32.totalorder %s2368_s7, %s2110_s21  ;;  %p2114_p2 = scmp.lt.u32.totalorder %s2110_s21, %s2368_s7 }
 0x539   :  { %p2116_p3 = pnand %p2114_p2, %p2111_p1 }
 0x53b   :  { %2119 = shalt.err (!%p2116_p3)
}
 0x53c   :  { %1523 = dma.vmem_to_hbm [thread:$0]  %s1521_s5, 32, %s2368_s7, [#allocation5]  }
 0x53d   :  { %2124 = dma.done.wait [#allocation5], 32  }
 0x53e   :  { %2125 = vsyncadd [#allocation5], 4294967264 }
 0x53f   :  { %1527 = vsyncpa [#allocation4], 1 }
 0x540   :  { %1528 = vsyncpa [#allocation7], 1 }
 0x541   :  { %1529 = vsyncpa [#allocation5], 1 }

</bundles_post_ra>
